<compile_context>
chip_gen: v6e
topology: v6e:2x2x1
jax: 0.10.0
libtpu: 0.0.40
codegen_flags: <defaults>
</compile_context>

<pallas_src>
import functools

import jax
import jax.numpy as jnp
from jax import lax
from jax.experimental import pallas as pl
from jax.experimental.pallas import tpu as pltpu


# ----------------------------- in-kernel helpers -----------------------------

def _gelu_exact(x):
    # PyTorch nn.GELU() default = exact erf-based GELU.
    return 0.5 * x * (1.0 + lax.erf(x * 0.7071067811865476))


def _layernorm(x, gamma, beta, eps=1e-5):
    mu = jnp.mean(x, axis=-1, keepdims=True)
    xc = x - mu
    var = jnp.mean(xc * xc, axis=-1, keepdims=True)  # population var (torch)
    return xc * lax.rsqrt(var + eps) * gamma + beta


# ----------------------------- slab row layout --------------------------------

def _align8(n):
    return -(-n // 8) * 8


def _make_slab_layout(d_t, d_v, d_fusion, nblk):
    """Row offsets of every weight/bias region inside the packed [rows, D] slab.

    Region starts are 8-aligned so every static row slice in the kernel stays
    sublane-tile aligned (no cross-tile copies).
    """
    D = d_fusion
    layout = {}
    r = 0
    layout["w_text"] = r; r = _align8(r + d_t)         # [d_t, D]
    layout["w_vis"] = r;  r = _align8(r + d_v)         # [d_v, D]
    layout["w_q"] = r;    r = _align8(r + nblk * D)    # nblk x [D, D]
    layout["w_o"] = r;    r = _align8(r + nblk * D)    # nblk x [D, D]
    layout["w_g"] = r;    r = _align8(r + 2 * D)       # [2D, D]
    layout["w_f"] = r;    r = _align8(r + D)           # [D, D]
    layout["bias"] = r                                  # 1 row per bias / LN vec
    n_bias = 2 + 6 * nblk + 4
    total = _align8(r + n_bias)
    return layout, total


# --------------------------------- kernel ------------------------------------

def fused_forward_kernel(t_ref, v_ref, wkv_ref, slab_ref, o_ref, *,
                         num_heads, num_layers, d_t, d_v, d_fusion, layout):
    f32 = jnp.float32
    D = d_fusion
    H = num_heads
    dh = D // H
    nblk = 2 * num_layers
    scale = 1.0 / float(dh) ** 0.5            # hoisted python-level constant

    wt0 = layout["w_text"]
    wv0 = layout["w_vis"]
    wq0 = layout["w_q"]
    wo0 = layout["w_o"]
    wg0 = layout["w_g"]
    wf0 = layout["w_f"]
    b0 = layout["bias"]

    def brow(r):
        # One bias / LayerNorm row -> [1, D] (broadcasts over the B sublanes).
        return slab_ref[b0 + r:b0 + r + 1, :]

    # ---- input projections + exact GELU ----
    t = _gelu_exact(jnp.dot(t_ref[...], slab_ref[wt0:wt0 + d_t, :],
                            preferred_element_type=f32) + brow(0))
    v = _gelu_exact(jnp.dot(v_ref[...], slab_ref[wv0:wv0 + d_v, :],
                            preferred_element_type=f32) + brow(1))

    def attn_block(blk, x_q, x_kv):
        # MultiheadAttention(query=x_q, key=x_kv, value=x_kv) + residual + LN.
        # TODO(synk): attention / residual dropout is identity (eval mode).
        base = 2 + 6 * blk                    # bq, bk, bv, bo, ln_g, ln_b rows
        bkv = jnp.concatenate([brow(base + 1), brow(base + 2)], axis=-1)  # [1,2D]

        # Fused projections: 2 wide dots per block instead of 3*H tiny ones.
        q = jnp.dot(x_q, slab_ref[wq0 + blk * D:wq0 + (blk + 1) * D, :],
                    preferred_element_type=f32) + brow(base)              # [B, D]
        kv = jnp.dot(x_kv, wkv_ref[blk], preferred_element_type=f32) + bkv  # [B, 2D]

        ctx_heads = []
        for h in range(H):                    # static unroll, H is small
            lo = h * dh
            q_h = q[:, lo:lo + dh]
            k_h = kv[:, lo:lo + dh]
            v_h = kv[:, D + lo:D + lo + dh]
            # scores = q_h @ k_h^T  (contract last dims, no explicit transpose)
            s = lax.dot_general(q_h, k_h, (((1,), (1,)), ((), ())),
                                preferred_element_type=f32) * scale
            s = s - jnp.max(s, axis=-1, keepdims=True)
            p = jnp.exp(s)
            p = p * pl.reciprocal(jnp.sum(p, axis=-1, keepdims=True), approx=True)
            ctx_heads.append(jnp.dot(p, v_h, preferred_element_type=f32))

        # Folded out-projection: lane-concat the H ctx tiles, single wide dot.
        ctx = jnp.concatenate(ctx_heads, axis=-1)                          # [B, D]
        out = jnp.dot(ctx, slab_ref[wo0 + blk * D:wo0 + (blk + 1) * D, :],
                      preferred_element_type=f32) + brow(base + 3)
        return _layernorm(x_q + out, brow(base + 4), brow(base + 5))

    # ---- cross-attention layers (static unroll over num_layers) ----
    for layer in range(num_layers):
        t = attn_block(2 * layer, t, v)       # t2v_attn + norm1
        v = attn_block(2 * layer + 1, v, t)   # v2t_attn + norm2

    # ---- gated fusion head ----
    tail = 2 + 6 * nblk
    tv = jnp.concatenate([t, v], axis=-1)                                  # [B, 2D]
    gate = jax.nn.sigmoid(jnp.dot(tv, slab_ref[wg0:wg0 + 2 * D, :],
                                  preferred_element_type=f32) + brow(tail))
    fused = gate * t + (1.0 - gate) * v
    fused = jnp.dot(fused, slab_ref[wf0:wf0 + D, :],
                    preferred_element_type=f32) + brow(tail + 1)
    o_ref[...] = _layernorm(fused + t + v, brow(tail + 2), brow(tail + 3))


# --------------------------------- wrapper -----------------------------------

def cross_modal_attention_forward(params, t_feats, v_feats, *,
                                  d_t, d_v, d_fusion, num_heads, num_layers):
    kernel = functools.partial(fused_forward_kernel,
                               num_heads=num_heads, num_layers=num_layers,
                               d_t=d_t, d_v=d_v, d_fusion=d_fusion,
                               layout=params["layout"])
    B = t_feats.shape[0]
    vmem = pltpu.MemorySpace.VMEM
    # Single grid point, everything resident in VMEM; 4 operand DMAs total.
    return pl.pallas_call(
        kernel,
        out_shape=jax.ShapeDtypeStruct((B, d_fusion), jnp.float32),
        in_specs=[pl.BlockSpec(memory_space=vmem)] * 4,
        out_specs=pl.BlockSpec(memory_space=vmem),
    )(t_feats, v_feats, params["wkv"], params["slab"])


# ------------------------------ parameter setup -------------------------------

def _linear(key, d_in, d_out, scale=0.05):
    kw, kb = jax.random.split(key)
    w = jax.random.normal(kw, (d_in, d_out), jnp.float32) * scale
    b = jax.random.normal(kb, (d_out,), jnp.float32) * scale
    return w, b


def init_params(key, d_t, d_v, d_fusion, num_heads, num_layers):
    D = d_fusion
    nblk = 2 * num_layers                     # t2v + v2t per layer
    layout, total_rows = _make_slab_layout(d_t, d_v, D, nblk)

    slab = jnp.zeros((total_rows, D), jnp.float32)
    n_bias = 2 + 6 * nblk + 4
    bias_rows = [None] * n_bias
    wkv_blocks = []

    keys = iter(jax.random.split(key, 4 + 4 * nblk))

    w, b = _linear(next(keys), d_t, D)
    slab = slab.at[layout["w_text"]:layout["w_text"] + d_t].set(w)
    bias_rows[0] = b
    w, b = _linear(next(keys), d_v, D)
    slab = slab.at[layout["w_vis"]:layout["w_vis"] + d_v].set(w)
    bias_rows[1] = b

    for blk in range(nblk):
        wq, bq = _linear(next(keys), D, D)
        wk, bk = _linear(next(keys), D, D)
        wv, bv = _linear(next(keys), D, D)
        wo, bo = _linear(next(keys), D, D)
        slab = slab.at[layout["w_q"] + blk * D:layout["w_q"] + (blk + 1) * D].set(wq)
        slab = slab.at[layout["w_o"] + blk * D:layout["w_o"] + (blk + 1) * D].set(wo)
        wkv_blocks.append(jnp.concatenate([wk, wv], axis=-1))   # [D, 2D]
        base = 2 + 6 * blk
        bias_rows[base + 0] = bq
        bias_rows[base + 1] = bk
        bias_rows[base + 2] = bv
        bias_rows[base + 3] = bo
        bias_rows[base + 4] = jnp.ones((D,), jnp.float32)       # LayerNorm gamma
        bias_rows[base + 5] = jnp.zeros((D,), jnp.float32)      # LayerNorm beta

    wg, bg = _linear(next(keys), 2 * D, D)
    wf, bf = _linear(next(keys), D, D)
    slab = slab.at[layout["w_g"]:layout["w_g"] + 2 * D].set(wg)
    slab = slab.at[layout["w_f"]:layout["w_f"] + D].set(wf)
    tail = 2 + 6 * nblk
    bias_rows[tail + 0] = bg
    bias_rows[tail + 1] = bf
    bias_rows[tail + 2] = jnp.ones((D,), jnp.float32)           # fusion LN gamma
    bias_rows[tail + 3] = jnp.zeros((D,), jnp.float32)          # fusion LN beta

    bias_block = jnp.stack(bias_rows, axis=0)                   # [n_bias, D]
    slab = slab.at[layout["bias"]:layout["bias"] + n_bias].set(bias_block)

    return {"slab": slab,
            "wkv": jnp.stack(wkv_blocks, axis=0),               # [nblk, D, 2D]
            "layout": layout}


# ----------------------------------- main -------------------------------------

if __name__ == "__main__":
    B, d_t, d_v, d_fusion, num_heads, num_layers = 8, 16, 24, 32, 4, 2

    root = jax.random.PRNGKey(0)
    k_params, k_t, k_v = jax.random.split(root, 3)

    params = init_params(k_params, d_t, d_v, d_fusion, num_heads, num_layers)
    t_feats = jax.random.normal(k_t, (B, d_t), jnp.float32)
    v_feats = jax.random.normal(k_v, (B, d_v), jnp.float32)

    out = cross_modal_attention_forward(params, t_feats, v_feats,
                                        d_t=d_t, d_v=d_v, d_fusion=d_fusion,
                                        num_heads=num_heads,
                                        num_layers=num_layers)
    out = jax.block_until_ready(out)
    assert out.shape == (B, d_fusion), out.shape
    print("KERNEL_OK")
</pallas_src>

<mosaic_0001>
module attributes {stable_mosaic.version = 11 : i64} {
  func.func @fused_forward_kernel(%arg0: memref<8x16xf32, #tpu.memory_space<vmem>>, %arg1: memref<8x24xf32, #tpu.memory_space<vmem>>, %arg2: memref<4x32x64xf32, #tpu.memory_space<vmem>>, %arg3: memref<424x32xf32, #tpu.memory_space<vmem>>, %arg4: memref<8x32xf32, #tpu.memory_space<vmem>>) attributes {dimension_semantics = [], scalar_prefetch = 0 : i64, scratch_operands = 0 : i64, tpu.core_type = #tpu.core_type<tc>} {
    %c0 = arith.constant 0 : index
    %c0_0 = arith.constant 0 : index
    %0 = vector.load %arg0[%c0, %c0_0] : memref<8x16xf32, #tpu.memory_space<vmem>>, vector<8x16xf32>
    %c0_1 = arith.constant 0 : index
    %c0_2 = arith.constant 0 : index
    %1 = vector.load %arg3[%c0_1, %c0_2] : memref<424x32xf32, #tpu.memory_space<vmem>>, vector<16x32xf32>
    %cst = arith.constant dense<0.000000e+00> : vector<8x32xf32>
    %2 = tpu.matmul %0, %1, %cst {dimension_numbers = #tpu.dot_dimension_numbers<[1], [0], [0], [1], [0, 0, 1, 1], [], []>} : vector<8x16xf32>, vector<16x32xf32>, vector<8x32xf32> -> vector<8x32xf32>
    %c392 = arith.constant 392 : index
    %c0_3 = arith.constant 0 : index
    %3 = vector.load %arg3[%c392, %c0_3] : memref<424x32xf32, #tpu.memory_space<vmem>>, vector<1x32xf32>
    %4 = vector.broadcast %3 : vector<1x32xf32> to vector<8x32xf32>
    %5 = arith.addf %2, %4 : vector<8x32xf32>
    %cst_4 = arith.constant 5.000000e-01 : f32
    %6 = vector.broadcast %cst_4 : f32 to vector<8x32xf32>
    %7 = arith.mulf %6, %5 : vector<8x32xf32>
    %cst_5 = arith.constant 0.707106769 : f32
    %8 = vector.broadcast %cst_5 : f32 to vector<8x32xf32>
    %9 = arith.mulf %5, %8 : vector<8x32xf32>
    %10 = math.erf %9 : vector<8x32xf32>
    %cst_6 = arith.constant 1.000000e+00 : f32
    %11 = vector.broadcast %cst_6 : f32 to vector<8x32xf32>
    %12 = arith.addf %11, %10 : vector<8x32xf32>
    %13 = arith.mulf %7, %12 : vector<8x32xf32>
    %c0_7 = arith.constant 0 : index
    %c0_8 = arith.constant 0 : index
    %14 = vector.load %arg1[%c0_7, %c0_8] : memref<8x24xf32, #tpu.memory_space<vmem>>, vector<8x24xf32>
    %c16 = arith.constant 16 : index
    %c0_9 = arith.constant 0 : index
    %15 = vector.load %arg3[%c16, %c0_9] : memref<424x32xf32, #tpu.memory_space<vmem>>, vector<24x32xf32>
    %cst_10 = arith.constant dense<0.000000e+00> : vector<8x32xf32>
    %16 = tpu.matmul %14, %15, %cst_10 {dimension_numbers = #tpu.dot_dimension_numbers<[1], [0], [0], [1], [0, 0, 1, 1], [], []>} : vector<8x24xf32>, vector<24x32xf32>, vector<8x32xf32> -> vector<8x32xf32>
    %c393 = arith.constant 393 : index
    %c0_11 = arith.constant 0 : index
    %17 = vector.load %arg3[%c393, %c0_11] : memref<424x32xf32, #tpu.memory_space<vmem>>, vector<1x32xf32>
    %18 = vector.broadcast %17 : vector<1x32xf32> to vector<8x32xf32>
    %19 = arith.addf %16, %18 : vector<8x32xf32>
    %cst_12 = arith.constant 5.000000e-01 : f32
    %20 = vector.broadcast %cst_12 : f32 to vector<8x32xf32>
    %21 = arith.mulf %20, %19 : vector<8x32xf32>
    %cst_13 = arith.constant 0.707106769 : f32
    %22 = vector.broadcast %cst_13 : f32 to vector<8x32xf32>
    %23 = arith.mulf %19, %22 : vector<8x32xf32>
    %24 = math.erf %23 : vector<8x32xf32>
    %cst_14 = arith.constant 1.000000e+00 : f32
    %25 = vector.broadcast %cst_14 : f32 to vector<8x32xf32>
    %26 = arith.addf %25, %24 : vector<8x32xf32>
    %27 = arith.mulf %21, %26 : vector<8x32xf32>
    %c395 = arith.constant 395 : index
    %c0_15 = arith.constant 0 : index
    %28 = vector.load %arg3[%c395, %c0_15] : memref<424x32xf32, #tpu.memory_space<vmem>>, vector<1x32xf32>
    %c396 = arith.constant 396 : index
    %c0_16 = arith.constant 0 : index
    %29 = vector.load %arg3[%c396, %c0_16] : memref<424x32xf32, #tpu.memory_space<vmem>>, vector<1x32xf32>
    %30 = tpu.concatenate %28, %29 in 1 : vector<1x32xf32>, vector<1x32xf32> -> vector<1x64xf32>
    %c40 = arith.constant 40 : index
    %c0_17 = arith.constant 0 : index
    %31 = vector.load %arg3[%c40, %c0_17] : memref<424x32xf32, #tpu.memory_space<vmem>>, vector<32x32xf32>
    %cst_18 = arith.constant dense<0.000000e+00> : vector<8x32xf32>
    %32 = tpu.matmul %13, %31, %cst_18 {dimension_numbers = #tpu.dot_dimension_numbers<[1], [0], [0], [1], [0, 0, 1, 1], [], []>} : vector<8x32xf32>, vector<32x32xf32>, vector<8x32xf32> -> vector<8x32xf32>
    %c394 = arith.constant 394 : index
    %c0_19 = arith.constant 0 : index
    %33 = vector.load %arg3[%c394, %c0_19] : memref<424x32xf32, #tpu.memory_space<vmem>>, vector<1x32xf32>
    %34 = vector.broadcast %33 : vector<1x32xf32> to vector<8x32xf32>
    %35 = arith.addf %32, %34 : vector<8x32xf32>
    %c0_20 = arith.constant 0 : index
    %c0_21 = arith.constant 0 : index
    %c0_22 = arith.constant 0 : index
    %36 = vector.load %arg2[%c0_20, %c0_21, %c0_22] : memref<4x32x64xf32, #tpu.memory_space<vmem>>, vector<1x32x64xf32>
    %37 = vector.shape_cast %36 : vector<1x32x64xf32> to vector<32x64xf32>
    %cst_23 = arith.constant dense<0.000000e+00> : vector<8x64xf32>
    %38 = tpu.matmul %27, %37, %cst_23 {dimension_numbers = #tpu.dot_dimension_numbers<[1], [0], [0], [1], [0, 0, 1, 1], [], []>} : vector<8x32xf32>, vector<32x64xf32>, vector<8x64xf32> -> vector<8x64xf32>
    %39 = vector.broadcast %30 : vector<1x64xf32> to vector<8x64xf32>
    %40 = arith.addf %38, %39 : vector<8x64xf32>
    %41 = vector.extract_strided_slice %35 {offsets = [0, 0], sizes = [8, 8], strides = [1, 1]} : vector<8x32xf32> to vector<8x8xf32>
    %42 = vector.extract_strided_slice %40 {offsets = [0, 0], sizes = [8, 8], strides = [1, 1]} : vector<8x64xf32> to vector<8x8xf32>
    %43 = vector.extract_strided_slice %40 {offsets = [0, 32], sizes = [8, 8], strides = [1, 1]} : vector<8x64xf32> to vector<8x8xf32>
    %cst_24 = arith.constant dense<0.000000e+00> : vector<8x8xf32>
    %44 = tpu.matmul %41, %42, %cst_24 {dimension_numbers = #tpu.dot_dimension_numbers<[1], [1], [0], [0], [0, 0, 1, 0], [], []>} : vector<8x8xf32>, vector<8x8xf32>, vector<8x8xf32> -> vector<8x8xf32>
    %cst_25 = arith.constant 0.353553385 : f32
    %45 = vector.broadcast %cst_25 : f32 to vector<8x8xf32>
    %46 = arith.mulf %44, %45 : vector<8x8xf32>
    %cst_26 = arith.constant dense<0xFF800000> : vector<8xf32>
    %47 = vector.multi_reduction <maximumf>, %46, %cst_26 [1] : vector<8x8xf32> to vector<8xf32>
    %48 = vector.shape_cast %47 : vector<8xf32> to vector<8x1xf32>
    %49 = vector.broadcast %48 : vector<8x1xf32> to vector<8x8xf32>
    %50 = arith.subf %46, %49 : vector<8x8xf32>
    %51 = math.exp %50 : vector<8x8xf32>
    %cst_27 = arith.constant dense<0.000000e+00> : vector<8xf32>
    %52 = vector.multi_reduction <add>, %51, %cst_27 [1] : vector<8x8xf32> to vector<8xf32>
    %53 = vector.shape_cast %52 : vector<8xf32> to vector<8x1xf32>
    %54 = tpu.reciprocal %53 {approx = true} : vector<8x1xf32> -> vector<8x1xf32>
    %55 = vector.broadcast %54 : vector<8x1xf32> to vector<8x8xf32>
    %56 = arith.mulf %51, %55 : vector<8x8xf32>
    %cst_28 = arith.constant dense<0.000000e+00> : vector<8x8xf32>
    %57 = tpu.matmul %56, %43, %cst_28 {dimension_numbers = #tpu.dot_dimension_numbers<[1], [0], [0], [1], [0, 0, 1, 1], [], []>} : vector<8x8xf32>, vector<8x8xf32>, vector<8x8xf32> -> vector<8x8xf32>
    %58 = vector.extract_strided_slice %35 {offsets = [0, 8], sizes = [8, 8], strides = [1, 1]} : vector<8x32xf32> to vector<8x8xf32>
    %59 = vector.extract_strided_slice %40 {offsets = [0, 8], sizes = [8, 8], strides = [1, 1]} : vector<8x64xf32> to vector<8x8xf32>
    %60 = vector.extract_strided_slice %40 {offsets = [0, 40], sizes = [8, 8], strides = [1, 1]} : vector<8x64xf32> to vector<8x8xf32>
    %cst_29 = arith.constant dense<0.000000e+00> : vector<8x8xf32>
    %61 = tpu.matmul %58, %59, %cst_29 {dimension_numbers = #tpu.dot_dimension_numbers<[1], [1], [0], [0], [0, 0, 1, 0], [], []>} : vector<8x8xf32>, vector<8x8xf32>, vector<8x8xf32> -> vector<8x8xf32>
    %cst_30 = arith.constant 0.353553385 : f32
    %62 = vector.broadcast %cst_30 : f32 to vector<8x8xf32>
    %63 = arith.mulf %61, %62 : vector<8x8xf32>
    %cst_31 = arith.constant dense<0xFF800000> : vector<8xf32>
    %64 = vector.multi_reduction <maximumf>, %63, %cst_31 [1] : vector<8x8xf32> to vector<8xf32>
    %65 = vector.shape_cast %64 : vector<8xf32> to vector<8x1xf32>
    %66 = vector.broadcast %65 : vector<8x1xf32> to vector<8x8xf32>
    %67 = arith.subf %63, %66 : vector<8x8xf32>
    %68 = math.exp %67 : vector<8x8xf32>
    %cst_32 = arith.constant dense<0.000000e+00> : vector<8xf32>
    %69 = vector.multi_reduction <add>, %68, %cst_32 [1] : vector<8x8xf32> to vector<8xf32>
    %70 = vector.shape_cast %69 : vector<8xf32> to vector<8x1xf32>
    %71 = tpu.reciprocal %70 {approx = true} : vector<8x1xf32> -> vector<8x1xf32>
    %72 = vector.broadcast %71 : vector<8x1xf32> to vector<8x8xf32>
    %73 = arith.mulf %68, %72 : vector<8x8xf32>
    %cst_33 = arith.constant dense<0.000000e+00> : vector<8x8xf32>
    %74 = tpu.matmul %73, %60, %cst_33 {dimension_numbers = #tpu.dot_dimension_numbers<[1], [0], [0], [1], [0, 0, 1, 1], [], []>} : vector<8x8xf32>, vector<8x8xf32>, vector<8x8xf32> -> vector<8x8xf32>
    %75 = vector.extract_strided_slice %35 {offsets = [0, 16], sizes = [8, 8], strides = [1, 1]} : vector<8x32xf32> to vector<8x8xf32>
    %76 = vector.extract_strided_slice %40 {offsets = [0, 16], sizes = [8, 8], strides = [1, 1]} : vector<8x64xf32> to vector<8x8xf32>
    %77 = vector.extract_strided_slice %40 {offsets = [0, 48], sizes = [8, 8], strides = [1, 1]} : vector<8x64xf32> to vector<8x8xf32>
    %cst_34 = arith.constant dense<0.000000e+00> : vector<8x8xf32>
    %78 = tpu.matmul %75, %76, %cst_34 {dimension_numbers = #tpu.dot_dimension_numbers<[1], [1], [0], [0], [0, 0, 1, 0], [], []>} : vector<8x8xf32>, vector<8x8xf32>, vector<8x8xf32> -> vector<8x8xf32>
    %cst_35 = arith.constant 0.353553385 : f32
    %79 = vector.broadcast %cst_35 : f32 to vector<8x8xf32>
    %80 = arith.mulf %78, %79 : vector<8x8xf32>
    %cst_36 = arith.constant dense<0xFF800000> : vector<8xf32>
    %81 = vector.multi_reduction <maximumf>, %80, %cst_36 [1] : vector<8x8xf32> to vector<8xf32>
    %82 = vector.shape_cast %81 : vector<8xf32> to vector<8x1xf32>
    %83 = vector.broadcast %82 : vector<8x1xf32> to vector<8x8xf32>
    %84 = arith.subf %80, %83 : vector<8x8xf32>
    %85 = math.exp %84 : vector<8x8xf32>
    %cst_37 = arith.constant dense<0.000000e+00> : vector<8xf32>
    %86 = vector.multi_reduction <add>, %85, %cst_37 [1] : vector<8x8xf32> to vector<8xf32>
    %87 = vector.shape_cast %86 : vector<8xf32> to vector<8x1xf32>
    %88 = tpu.reciprocal %87 {approx = true} : vector<8x1xf32> -> vector<8x1xf32>
    %89 = vector.broadcast %88 : vector<8x1xf32> to vector<8x8xf32>
    %90 = arith.mulf %85, %89 : vector<8x8xf32>
    %cst_38 = arith.constant dense<0.000000e+00> : vector<8x8xf32>
    %91 = tpu.matmul %90, %77, %cst_38 {dimension_numbers = #tpu.dot_dimension_numbers<[1], [0], [0], [1], [0, 0, 1, 1], [], []>} : vector<8x8xf32>, vector<8x8xf32>, vector<8x8xf32> -> vector<8x8xf32>
    %92 = vector.extract_strided_slice %35 {offsets = [0, 24], sizes = [8, 8], strides = [1, 1]} : vector<8x32xf32> to vector<8x8xf32>
    %93 = vector.extract_strided_slice %40 {offsets = [0, 24], sizes = [8, 8], strides = [1, 1]} : vector<8x64xf32> to vector<8x8xf32>
    %94 = vector.extract_strided_slice %40 {offsets = [0, 56], sizes = [8, 8], strides = [1, 1]} : vector<8x64xf32> to vector<8x8xf32>
    %cst_39 = arith.constant dense<0.000000e+00> : vector<8x8xf32>
    %95 = tpu.matmul %92, %93, %cst_39 {dimension_numbers = #tpu.dot_dimension_numbers<[1], [1], [0], [0], [0, 0, 1, 0], [], []>} : vector<8x8xf32>, vector<8x8xf32>, vector<8x8xf32> -> vector<8x8xf32>
    %cst_40 = arith.constant 0.353553385 : f32
    %96 = vector.broadcast %cst_40 : f32 to vector<8x8xf32>
    %97 = arith.mulf %95, %96 : vector<8x8xf32>
    %cst_41 = arith.constant dense<0xFF800000> : vector<8xf32>
    %98 = vector.multi_reduction <maximumf>, %97, %cst_41 [1] : vector<8x8xf32> to vector<8xf32>
    %99 = vector.shape_cast %98 : vector<8xf32> to vector<8x1xf32>
    %100 = vector.broadcast %99 : vector<8x1xf32> to vector<8x8xf32>
    %101 = arith.subf %97, %100 : vector<8x8xf32>
    %102 = math.exp %101 : vector<8x8xf32>
    %cst_42 = arith.constant dense<0.000000e+00> : vector<8xf32>
    %103 = vector.multi_reduction <add>, %102, %cst_42 [1] : vector<8x8xf32> to vector<8xf32>
    %104 = vector.shape_cast %103 : vector<8xf32> to vector<8x1xf32>
    %105 = tpu.reciprocal %104 {approx = true} : vector<8x1xf32> -> vector<8x1xf32>
    %106 = vector.broadcast %105 : vector<8x1xf32> to vector<8x8xf32>
    %107 = arith.mulf %102, %106 : vector<8x8xf32>
    %cst_43 = arith.constant dense<0.000000e+00> : vector<8x8xf32>
    %108 = tpu.matmul %107, %94, %cst_43 {dimension_numbers = #tpu.dot_dimension_numbers<[1], [0], [0], [1], [0, 0, 1, 1], [], []>} : vector<8x8xf32>, vector<8x8xf32>, vector<8x8xf32> -> vector<8x8xf32>
    %109 = tpu.concatenate %57, %74, %91, %108 in 1 : vector<8x8xf32>, vector<8x8xf32>, vector<8x8xf32>, vector<8x8xf32> -> vector<8x32xf32>
    %c168 = arith.constant 168 : index
    %c0_44 = arith.constant 0 : index
    %110 = vector.load %arg3[%c168, %c0_44] : memref<424x32xf32, #tpu.memory_space<vmem>>, vector<32x32xf32>
    %cst_45 = arith.constant dense<0.000000e+00> : vector<8x32xf32>
    %111 = tpu.matmul %109, %110, %cst_45 {dimension_numbers = #tpu.dot_dimension_numbers<[1], [0], [0], [1], [0, 0, 1, 1], [], []>} : vector<8x32xf32>, vector<32x32xf32>, vector<8x32xf32> -> vector<8x32xf32>
    %c397 = arith.constant 397 : index
    %c0_46 = arith.constant 0 : index
    %112 = vector.load %arg3[%c397, %c0_46] : memref<424x32xf32, #tpu.memory_space<vmem>>, vector<1x32xf32>
    %113 = vector.broadcast %112 : vector<1x32xf32> to vector<8x32xf32>
    %114 = arith.addf %111, %113 : vector<8x32xf32>
    %115 = arith.addf %13, %114 : vector<8x32xf32>
    %c398 = arith.constant 398 : index
    %c0_47 = arith.constant 0 : index
    %116 = vector.load %arg3[%c398, %c0_47] : memref<424x32xf32, #tpu.memory_space<vmem>>, vector<1x32xf32>
    %c399 = arith.constant 399 : index
    %c0_48 = arith.constant 0 : index
    %117 = vector.load %arg3[%c399, %c0_48] : memref<424x32xf32, #tpu.memory_space<vmem>>, vector<1x32xf32>
    %cst_49 = arith.constant dense<0.000000e+00> : vector<8xf32>
    %118 = vector.multi_reduction <add>, %115, %cst_49 [1] : vector<8x32xf32> to vector<8xf32>
    %119 = vector.shape_cast %118 : vector<8xf32> to vector<8x1xf32>
    %cst_50 = arith.constant 3.200000e+01 : f32
    %120 = vector.broadcast %cst_50 : f32 to vector<8x1xf32>
    %121 = arith.divf %119, %120 : vector<8x1xf32>
    %122 = vector.broadcast %121 : vector<8x1xf32> to vector<8x32xf32>
    %123 = arith.subf %115, %122 : vector<8x32xf32>
    %124 = arith.mulf %123, %123 : vector<8x32xf32>
    %cst_51 = arith.constant dense<0.000000e+00> : vector<8xf32>
    %125 = vector.multi_reduction <add>, %124, %cst_51 [1] : vector<8x32xf32> to vector<8xf32>
    %126 = vector.shape_cast %125 : vector<8xf32> to vector<8x1xf32>
    %cst_52 = arith.constant 3.200000e+01 : f32
    %127 = vector.broadcast %cst_52 : f32 to vector<8x1xf32>
    %128 = arith.divf %126, %127 : vector<8x1xf32>
    %cst_53 = arith.constant 9.99999974E-6 : f32
    %129 = vector.broadcast %cst_53 : f32 to vector<8x1xf32>
    %130 = arith.addf %128, %129 : vector<8x1xf32>
    %131 = math.rsqrt %130 : vector<8x1xf32>
    %132 = vector.broadcast %131 : vector<8x1xf32> to vector<8x32xf32>
    %133 = arith.mulf %123, %132 : vector<8x32xf32>
    %134 = vector.broadcast %116 : vector<1x32xf32> to vector<8x32xf32>
    %135 = arith.mulf %133, %134 : vector<8x32xf32>
    %136 = vector.broadcast %117 : vector<1x32xf32> to vector<8x32xf32>
    %137 = arith.addf %135, %136 : vector<8x32xf32>
    %c401 = arith.constant 401 : index
    %c0_54 = arith.constant 0 : index
    %138 = vector.load %arg3[%c401, %c0_54] : memref<424x32xf32, #tpu.memory_space<vmem>>, vector<1x32xf32>
    %c402 = arith.constant 402 : index
    %c0_55 = arith.constant 0 : index
    %139 = vector.load %arg3[%c402, %c0_55] : memref<424x32xf32, #tpu.memory_space<vmem>>, vector<1x32xf32>
    %140 = tpu.concatenate %138, %139 in 1 : vector<1x32xf32>, vector<1x32xf32> -> vector<1x64xf32>
    %c72 = arith.constant 72 : index
    %c0_56 = arith.constant 0 : index
    %141 = vector.load %arg3[%c72, %c0_56] : memref<424x32xf32, #tpu.memory_space<vmem>>, vector<32x32xf32>
    %cst_57 = arith.constant dense<0.000000e+00> : vector<8x32xf32>
    %142 = tpu.matmul %27, %141, %cst_57 {dimension_numbers = #tpu.dot_dimension_numbers<[1], [0], [0], [1], [0, 0, 1, 1], [], []>} : vector<8x32xf32>, vector<32x32xf32>, vector<8x32xf32> -> vector<8x32xf32>
    %c400 = arith.constant 400 : index
    %c0_58 = arith.constant 0 : index
    %143 = vector.load %arg3[%c400, %c0_58] : memref<424x32xf32, #tpu.memory_space<vmem>>, vector<1x32xf32>
    %144 = vector.broadcast %143 : vector<1x32xf32> to vector<8x32xf32>
    %145 = arith.addf %142, %144 : vector<8x32xf32>
    %c1 = arith.constant 1 : index
    %c0_59 = arith.constant 0 : index
    %c0_60 = arith.constant 0 : index
    %146 = vector.load %arg2[%c1, %c0_59, %c0_60] : memref<4x32x64xf32, #tpu.memory_space<vmem>>, vector<1x32x64xf32>
    %147 = vector.shape_cast %146 : vector<1x32x64xf32> to vector<32x64xf32>
    %cst_61 = arith.constant dense<0.000000e+00> : vector<8x64xf32>
    %148 = tpu.matmul %137, %147, %cst_61 {dimension_numbers = #tpu.dot_dimension_numbers<[1], [0], [0], [1], [0, 0, 1, 1], [], []>} : vector<8x32xf32>, vector<32x64xf32>, vector<8x64xf32> -> vector<8x64xf32>
    %149 = vector.broadcast %140 : vector<1x64xf32> to vector<8x64xf32>
    %150 = arith.addf %148, %149 : vector<8x64xf32>
    %151 = vector.extract_strided_slice %145 {offsets = [0, 0], sizes = [8, 8], strides = [1, 1]} : vector<8x32xf32> to vector<8x8xf32>
    %152 = vector.extract_strided_slice %150 {offsets = [0, 0], sizes = [8, 8], strides = [1, 1]} : vector<8x64xf32> to vector<8x8xf32>
    %153 = vector.extract_strided_slice %150 {offsets = [0, 32], sizes = [8, 8], strides = [1, 1]} : vector<8x64xf32> to vector<8x8xf32>
    %cst_62 = arith.constant dense<0.000000e+00> : vector<8x8xf32>
    %154 = tpu.matmul %151, %152, %cst_62 {dimension_numbers = #tpu.dot_dimension_numbers<[1], [1], [0], [0], [0, 0, 1, 0], [], []>} : vector<8x8xf32>, vector<8x8xf32>, vector<8x8xf32> -> vector<8x8xf32>
    %cst_63 = arith.constant 0.353553385 : f32
    %155 = vector.broadcast %cst_63 : f32 to vector<8x8xf32>
    %156 = arith.mulf %154, %155 : vector<8x8xf32>
    %cst_64 = arith.constant dense<0xFF800000> : vector<8xf32>
    %157 = vector.multi_reduction <maximumf>, %156, %cst_64 [1] : vector<8x8xf32> to vector<8xf32>
    %158 = vector.shape_cast %157 : vector<8xf32> to vector<8x1xf32>
    %159 = vector.broadcast %158 : vector<8x1xf32> to vector<8x8xf32>
    %160 = arith.subf %156, %159 : vector<8x8xf32>
    %161 = math.exp %160 : vector<8x8xf32>
    %cst_65 = arith.constant dense<0.000000e+00> : vector<8xf32>
    %162 = vector.multi_reduction <add>, %161, %cst_65 [1] : vector<8x8xf32> to vector<8xf32>
    %163 = vector.shape_cast %162 : vector<8xf32> to vector<8x1xf32>
    %164 = tpu.reciprocal %163 {approx = true} : vector<8x1xf32> -> vector<8x1xf32>
    %165 = vector.broadcast %164 : vector<8x1xf32> to vector<8x8xf32>
    %166 = arith.mulf %161, %165 : vector<8x8xf32>
    %cst_66 = arith.constant dense<0.000000e+00> : vector<8x8xf32>
    %167 = tpu.matmul %166, %153, %cst_66 {dimension_numbers = #tpu.dot_dimension_numbers<[1], [0], [0], [1], [0, 0, 1, 1], [], []>} : vector<8x8xf32>, vector<8x8xf32>, vector<8x8xf32> -> vector<8x8xf32>
    %168 = vector.extract_strided_slice %145 {offsets = [0, 8], sizes = [8, 8], strides = [1, 1]} : vector<8x32xf32> to vector<8x8xf32>
    %169 = vector.extract_strided_slice %150 {offsets = [0, 8], sizes = [8, 8], strides = [1, 1]} : vector<8x64xf32> to vector<8x8xf32>
    %170 = vector.extract_strided_slice %150 {offsets = [0, 40], sizes = [8, 8], strides = [1, 1]} : vector<8x64xf32> to vector<8x8xf32>
    %cst_67 = arith.constant dense<0.000000e+00> : vector<8x8xf32>
    %171 = tpu.matmul %168, %169, %cst_67 {dimension_numbers = #tpu.dot_dimension_numbers<[1], [1], [0], [0], [0, 0, 1, 0], [], []>} : vector<8x8xf32>, vector<8x8xf32>, vector<8x8xf32> -> vector<8x8xf32>
    %cst_68 = arith.constant 0.353553385 : f32
    %172 = vector.broadcast %cst_68 : f32 to vector<8x8xf32>
    %173 = arith.mulf %171, %172 : vector<8x8xf32>
    %cst_69 = arith.constant dense<0xFF800000> : vector<8xf32>
    %174 = vector.multi_reduction <maximumf>, %173, %cst_69 [1] : vector<8x8xf32> to vector<8xf32>
    %175 = vector.shape_cast %174 : vector<8xf32> to vector<8x1xf32>
    %176 = vector.broadcast %175 : vector<8x1xf32> to vector<8x8xf32>
    %177 = arith.subf %173, %176 : vector<8x8xf32>
    %178 = math.exp %177 : vector<8x8xf32>
    %cst_70 = arith.constant dense<0.000000e+00> : vector<8xf32>
    %179 = vector.multi_reduction <add>, %178, %cst_70 [1] : vector<8x8xf32> to vector<8xf32>
    %180 = vector.shape_cast %179 : vector<8xf32> to vector<8x1xf32>
    %181 = tpu.reciprocal %180 {approx = true} : vector<8x1xf32> -> vector<8x1xf32>
    %182 = vector.broadcast %181 : vector<8x1xf32> to vector<8x8xf32>
    %183 = arith.mulf %178, %182 : vector<8x8xf32>
    %cst_71 = arith.constant dense<0.000000e+00> : vector<8x8xf32>
    %184 = tpu.matmul %183, %170, %cst_71 {dimension_numbers = #tpu.dot_dimension_numbers<[1], [0], [0], [1], [0, 0, 1, 1], [], []>} : vector<8x8xf32>, vector<8x8xf32>, vector<8x8xf32> -> vector<8x8xf32>
    %185 = vector.extract_strided_slice %145 {offsets = [0, 16], sizes = [8, 8], strides = [1, 1]} : vector<8x32xf32> to vector<8x8xf32>
    %186 = vector.extract_strided_slice %150 {offsets = [0, 16], sizes = [8, 8], strides = [1, 1]} : vector<8x64xf32> to vector<8x8xf32>
    %187 = vector.extract_strided_slice %150 {offsets = [0, 48], sizes = [8, 8], strides = [1, 1]} : vector<8x64xf32> to vector<8x8xf32>
    %cst_72 = arith.constant dense<0.000000e+00> : vector<8x8xf32>
    %188 = tpu.matmul %185, %186, %cst_72 {dimension_numbers = #tpu.dot_dimension_numbers<[1], [1], [0], [0], [0, 0, 1, 0], [], []>} : vector<8x8xf32>, vector<8x8xf32>, vector<8x8xf32> -> vector<8x8xf32>
    %cst_73 = arith.constant 0.353553385 : f32
    %189 = vector.broadcast %cst_73 : f32 to vector<8x8xf32>
    %190 = arith.mulf %188, %189 : vector<8x8xf32>
    %cst_74 = arith.constant dense<0xFF800000> : vector<8xf32>
    %191 = vector.multi_reduction <maximumf>, %190, %cst_74 [1] : vector<8x8xf32> to vector<8xf32>
    %192 = vector.shape_cast %191 : vector<8xf32> to vector<8x1xf32>
    %193 = vector.broadcast %192 : vector<8x1xf32> to vector<8x8xf32>
    %194 = arith.subf %190, %193 : vector<8x8xf32>
    %195 = math.exp %194 : vector<8x8xf32>
    %cst_75 = arith.constant dense<0.000000e+00> : vector<8xf32>
    %196 = vector.multi_reduction <add>, %195, %cst_75 [1] : vector<8x8xf32> to vector<8xf32>
    %197 = vector.shape_cast %196 : vector<8xf32> to vector<8x1xf32>
    %198 = tpu.reciprocal %197 {approx = true} : vector<8x1xf32> -> vector<8x1xf32>
    %199 = vector.broadcast %198 : vector<8x1xf32> to vector<8x8xf32>
    %200 = arith.mulf %195, %199 : vector<8x8xf32>
    %cst_76 = arith.constant dense<0.000000e+00> : vector<8x8xf32>
    %201 = tpu.matmul %200, %187, %cst_76 {dimension_numbers = #tpu.dot_dimension_numbers<[1], [0], [0], [1], [0, 0, 1, 1], [], []>} : vector<8x8xf32>, vector<8x8xf32>, vector<8x8xf32> -> vector<8x8xf32>
    %202 = vector.extract_strided_slice %145 {offsets = [0, 24], sizes = [8, 8], strides = [1, 1]} : vector<8x32xf32> to vector<8x8xf32>
    %203 = vector.extract_strided_slice %150 {offsets = [0, 24], sizes = [8, 8], strides = [1, 1]} : vector<8x64xf32> to vector<8x8xf32>
    %204 = vector.extract_strided_slice %150 {offsets = [0, 56], sizes = [8, 8], strides = [1, 1]} : vector<8x64xf32> to vector<8x8xf32>
    %cst_77 = arith.constant dense<0.000000e+00> : vector<8x8xf32>
    %205 = tpu.matmul %202, %203, %cst_77 {dimension_numbers = #tpu.dot_dimension_numbers<[1], [1], [0], [0], [0, 0, 1, 0], [], []>} : vector<8x8xf32>, vector<8x8xf32>, vector<8x8xf32> -> vector<8x8xf32>
    %cst_78 = arith.constant 0.353553385 : f32
    %206 = vector.broadcast %cst_78 : f32 to vector<8x8xf32>
    %207 = arith.mulf %205, %206 : vector<8x8xf32>
    %cst_79 = arith.constant dense<0xFF800000> : vector<8xf32>
    %208 = vector.multi_reduction <maximumf>, %207, %cst_79 [1] : vector<8x8xf32> to vector<8xf32>
    %209 = vector.shape_cast %208 : vector<8xf32> to vector<8x1xf32>
    %210 = vector.broadcast %209 : vector<8x1xf32> to vector<8x8xf32>
    %211 = arith.subf %207, %210 : vector<8x8xf32>
    %212 = math.exp %211 : vector<8x8xf32>
    %cst_80 = arith.constant dense<0.000000e+00> : vector<8xf32>
    %213 = vector.multi_reduction <add>, %212, %cst_80 [1] : vector<8x8xf32> to vector<8xf32>
    %214 = vector.shape_cast %213 : vector<8xf32> to vector<8x1xf32>
    %215 = tpu.reciprocal %214 {approx = true} : vector<8x1xf32> -> vector<8x1xf32>
    %216 = vector.broadcast %215 : vector<8x1xf32> to vector<8x8xf32>
    %217 = arith.mulf %212, %216 : vector<8x8xf32>
    %cst_81 = arith.constant dense<0.000000e+00> : vector<8x8xf32>
    %218 = tpu.matmul %217, %204, %cst_81 {dimension_numbers = #tpu.dot_dimension_numbers<[1], [0], [0], [1], [0, 0, 1, 1], [], []>} : vector<8x8xf32>, vector<8x8xf32>, vector<8x8xf32> -> vector<8x8xf32>
    %219 = tpu.concatenate %167, %184, %201, %218 in 1 : vector<8x8xf32>, vector<8x8xf32>, vector<8x8xf32>, vector<8x8xf32> -> vector<8x32xf32>
    %c200 = arith.constant 200 : index
    %c0_82 = arith.constant 0 : index
    %220 = vector.load %arg3[%c200, %c0_82] : memref<424x32xf32, #tpu.memory_space<vmem>>, vector<32x32xf32>
    %cst_83 = arith.constant dense<0.000000e+00> : vector<8x32xf32>
    %221 = tpu.matmul %219, %220, %cst_83 {dimension_numbers = #tpu.dot_dimension_numbers<[1], [0], [0], [1], [0, 0, 1, 1], [], []>} : vector<8x32xf32>, vector<32x32xf32>, vector<8x32xf32> -> vector<8x32xf32>
    %c403 = arith.constant 403 : index
    %c0_84 = arith.constant 0 : index
    %222 = vector.load %arg3[%c403, %c0_84] : memref<424x32xf32, #tpu.memory_space<vmem>>, vector<1x32xf32>
    %223 = vector.broadcast %222 : vector<1x32xf32> to vector<8x32xf32>
    %224 = arith.addf %221, %223 : vector<8x32xf32>
    %225 = arith.addf %27, %224 : vector<8x32xf32>
    %c404 = arith.constant 404 : index
    %c0_85 = arith.constant 0 : index
    %226 = vector.load %arg3[%c404, %c0_85] : memref<424x32xf32, #tpu.memory_space<vmem>>, vector<1x32xf32>
    %c405 = arith.constant 405 : index
    %c0_86 = arith.constant 0 : index
    %227 = vector.load %arg3[%c405, %c0_86] : memref<424x32xf32, #tpu.memory_space<vmem>>, vector<1x32xf32>
    %cst_87 = arith.constant dense<0.000000e+00> : vector<8xf32>
    %228 = vector.multi_reduction <add>, %225, %cst_87 [1] : vector<8x32xf32> to vector<8xf32>
    %229 = vector.shape_cast %228 : vector<8xf32> to vector<8x1xf32>
    %cst_88 = arith.constant 3.200000e+01 : f32
    %230 = vector.broadcast %cst_88 : f32 to vector<8x1xf32>
    %231 = arith.divf %229, %230 : vector<8x1xf32>
    %232 = vector.broadcast %231 : vector<8x1xf32> to vector<8x32xf32>
    %233 = arith.subf %225, %232 : vector<8x32xf32>
    %234 = arith.mulf %233, %233 : vector<8x32xf32>
    %cst_89 = arith.constant dense<0.000000e+00> : vector<8xf32>
    %235 = vector.multi_reduction <add>, %234, %cst_89 [1] : vector<8x32xf32> to vector<8xf32>
    %236 = vector.shape_cast %235 : vector<8xf32> to vector<8x1xf32>
    %cst_90 = arith.constant 3.200000e+01 : f32
    %237 = vector.broadcast %cst_90 : f32 to vector<8x1xf32>
    %238 = arith.divf %236, %237 : vector<8x1xf32>
    %cst_91 = arith.constant 9.99999974E-6 : f32
    %239 = vector.broadcast %cst_91 : f32 to vector<8x1xf32>
    %240 = arith.addf %238, %239 : vector<8x1xf32>
    %241 = math.rsqrt %240 : vector<8x1xf32>
    %242 = vector.broadcast %241 : vector<8x1xf32> to vector<8x32xf32>
    %243 = arith.mulf %233, %242 : vector<8x32xf32>
    %244 = vector.broadcast %226 : vector<1x32xf32> to vector<8x32xf32>
    %245 = arith.mulf %243, %244 : vector<8x32xf32>
    %246 = vector.broadcast %227 : vector<1x32xf32> to vector<8x32xf32>
    %247 = arith.addf %245, %246 : vector<8x32xf32>
    %c407 = arith.constant 407 : index
    %c0_92 = arith.constant 0 : index
    %248 = vector.load %arg3[%c407, %c0_92] : memref<424x32xf32, #tpu.memory_space<vmem>>, vector<1x32xf32>
    %c408 = arith.constant 408 : index
    %c0_93 = arith.constant 0 : index
    %249 = vector.load %arg3[%c408, %c0_93] : memref<424x32xf32, #tpu.memory_space<vmem>>, vector<1x32xf32>
    %250 = tpu.concatenate %248, %249 in 1 : vector<1x32xf32>, vector<1x32xf32> -> vector<1x64xf32>
    %c104 = arith.constant 104 : index
    %c0_94 = arith.constant 0 : index
    %251 = vector.load %arg3[%c104, %c0_94] : memref<424x32xf32, #tpu.memory_space<vmem>>, vector<32x32xf32>
    %cst_95 = arith.constant dense<0.000000e+00> : vector<8x32xf32>
    %252 = tpu.matmul %137, %251, %cst_95 {dimension_numbers = #tpu.dot_dimension_numbers<[1], [0], [0], [1], [0, 0, 1, 1], [], []>} : vector<8x32xf32>, vector<32x32xf32>, vector<8x32xf32> -> vector<8x32xf32>
    %c406 = arith.constant 406 : index
    %c0_96 = arith.constant 0 : index
    %253 = vector.load %arg3[%c406, %c0_96] : memref<424x32xf32, #tpu.memory_space<vmem>>, vector<1x32xf32>
    %254 = vector.broadcast %253 : vector<1x32xf32> to vector<8x32xf32>
    %255 = arith.addf %252, %254 : vector<8x32xf32>
    %c2 = arith.constant 2 : index
    %c0_97 = arith.constant 0 : index
    %c0_98 = arith.constant 0 : index
    %256 = vector.load %arg2[%c2, %c0_97, %c0_98] : memref<4x32x64xf32, #tpu.memory_space<vmem>>, vector<1x32x64xf32>
    %257 = vector.shape_cast %256 : vector<1x32x64xf32> to vector<32x64xf32>
    %cst_99 = arith.constant dense<0.000000e+00> : vector<8x64xf32>
    %258 = tpu.matmul %247, %257, %cst_99 {dimension_numbers = #tpu.dot_dimension_numbers<[1], [0], [0], [1], [0, 0, 1, 1], [], []>} : vector<8x32xf32>, vector<32x64xf32>, vector<8x64xf32> -> vector<8x64xf32>
    %259 = vector.broadcast %250 : vector<1x64xf32> to vector<8x64xf32>
    %260 = arith.addf %258, %259 : vector<8x64xf32>
    %261 = vector.extract_strided_slice %255 {offsets = [0, 0], sizes = [8, 8], strides = [1, 1]} : vector<8x32xf32> to vector<8x8xf32>
    %262 = vector.extract_strided_slice %260 {offsets = [0, 0], sizes = [8, 8], strides = [1, 1]} : vector<8x64xf32> to vector<8x8xf32>
    %263 = vector.extract_strided_slice %260 {offsets = [0, 32], sizes = [8, 8], strides = [1, 1]} : vector<8x64xf32> to vector<8x8xf32>
    %cst_100 = arith.constant dense<0.000000e+00> : vector<8x8xf32>
    %264 = tpu.matmul %261, %262, %cst_100 {dimension_numbers = #tpu.dot_dimension_numbers<[1], [1], [0], [0], [0, 0, 1, 0], [], []>} : vector<8x8xf32>, vector<8x8xf32>, vector<8x8xf32> -> vector<8x8xf32>
    %cst_101 = arith.constant 0.353553385 : f32
    %265 = vector.broadcast %cst_101 : f32 to vector<8x8xf32>
    %266 = arith.mulf %264, %265 : vector<8x8xf32>
    %cst_102 = arith.constant dense<0xFF800000> : vector<8xf32>
    %267 = vector.multi_reduction <maximumf>, %266, %cst_102 [1] : vector<8x8xf32> to vector<8xf32>
    %268 = vector.shape_cast %267 : vector<8xf32> to vector<8x1xf32>
    %269 = vector.broadcast %268 : vector<8x1xf32> to vector<8x8xf32>
    %270 = arith.subf %266, %269 : vector<8x8xf32>
    %271 = math.exp %270 : vector<8x8xf32>
    %cst_103 = arith.constant dense<0.000000e+00> : vector<8xf32>
    %272 = vector.multi_reduction <add>, %271, %cst_103 [1] : vector<8x8xf32> to vector<8xf32>
    %273 = vector.shape_cast %272 : vector<8xf32> to vector<8x1xf32>
    %274 = tpu.reciprocal %273 {approx = true} : vector<8x1xf32> -> vector<8x1xf32>
    %275 = vector.broadcast %274 : vector<8x1xf32> to vector<8x8xf32>
    %276 = arith.mulf %271, %275 : vector<8x8xf32>
    %cst_104 = arith.constant dense<0.000000e+00> : vector<8x8xf32>
    %277 = tpu.matmul %276, %263, %cst_104 {dimension_numbers = #tpu.dot_dimension_numbers<[1], [0], [0], [1], [0, 0, 1, 1], [], []>} : vector<8x8xf32>, vector<8x8xf32>, vector<8x8xf32> -> vector<8x8xf32>
    %278 = vector.extract_strided_slice %255 {offsets = [0, 8], sizes = [8, 8], strides = [1, 1]} : vector<8x32xf32> to vector<8x8xf32>
    %279 = vector.extract_strided_slice %260 {offsets = [0, 8], sizes = [8, 8], strides = [1, 1]} : vector<8x64xf32> to vector<8x8xf32>
    %280 = vector.extract_strided_slice %260 {offsets = [0, 40], sizes = [8, 8], strides = [1, 1]} : vector<8x64xf32> to vector<8x8xf32>
    %cst_105 = arith.constant dense<0.000000e+00> : vector<8x8xf32>
    %281 = tpu.matmul %278, %279, %cst_105 {dimension_numbers = #tpu.dot_dimension_numbers<[1], [1], [0], [0], [0, 0, 1, 0], [], []>} : vector<8x8xf32>, vector<8x8xf32>, vector<8x8xf32> -> vector<8x8xf32>
    %cst_106 = arith.constant 0.353553385 : f32
    %282 = vector.broadcast %cst_106 : f32 to vector<8x8xf32>
    %283 = arith.mulf %281, %282 : vector<8x8xf32>
    %cst_107 = arith.constant dense<0xFF800000> : vector<8xf32>
    %284 = vector.multi_reduction <maximumf>, %283, %cst_107 [1] : vector<8x8xf32> to vector<8xf32>
    %285 = vector.shape_cast %284 : vector<8xf32> to vector<8x1xf32>
    %286 = vector.broadcast %285 : vector<8x1xf32> to vector<8x8xf32>
    %287 = arith.subf %283, %286 : vector<8x8xf32>
    %288 = math.exp %287 : vector<8x8xf32>
    %cst_108 = arith.constant dense<0.000000e+00> : vector<8xf32>
    %289 = vector.multi_reduction <add>, %288, %cst_108 [1] : vector<8x8xf32> to vector<8xf32>
    %290 = vector.shape_cast %289 : vector<8xf32> to vector<8x1xf32>
    %291 = tpu.reciprocal %290 {approx = true} : vector<8x1xf32> -> vector<8x1xf32>
    %292 = vector.broadcast %291 : vector<8x1xf32> to vector<8x8xf32>
    %293 = arith.mulf %288, %292 : vector<8x8xf32>
    %cst_109 = arith.constant dense<0.000000e+00> : vector<8x8xf32>
    %294 = tpu.matmul %293, %280, %cst_109 {dimension_numbers = #tpu.dot_dimension_numbers<[1], [0], [0], [1], [0, 0, 1, 1], [], []>} : vector<8x8xf32>, vector<8x8xf32>, vector<8x8xf32> -> vector<8x8xf32>
    %295 = vector.extract_strided_slice %255 {offsets = [0, 16], sizes = [8, 8], strides = [1, 1]} : vector<8x32xf32> to vector<8x8xf32>
    %296 = vector.extract_strided_slice %260 {offsets = [0, 16], sizes = [8, 8], strides = [1, 1]} : vector<8x64xf32> to vector<8x8xf32>
    %297 = vector.extract_strided_slice %260 {offsets = [0, 48], sizes = [8, 8], strides = [1, 1]} : vector<8x64xf32> to vector<8x8xf32>
    %cst_110 = arith.constant dense<0.000000e+00> : vector<8x8xf32>
    %298 = tpu.matmul %295, %296, %cst_110 {dimension_numbers = #tpu.dot_dimension_numbers<[1], [1], [0], [0], [0, 0, 1, 0], [], []>} : vector<8x8xf32>, vector<8x8xf32>, vector<8x8xf32> -> vector<8x8xf32>
    %cst_111 = arith.constant 0.353553385 : f32
    %299 = vector.broadcast %cst_111 : f32 to vector<8x8xf32>
    %300 = arith.mulf %298, %299 : vector<8x8xf32>
    %cst_112 = arith.constant dense<0xFF800000> : vector<8xf32>
    %301 = vector.multi_reduction <maximumf>, %300, %cst_112 [1] : vector<8x8xf32> to vector<8xf32>
    %302 = vector.shape_cast %301 : vector<8xf32> to vector<8x1xf32>
    %303 = vector.broadcast %302 : vector<8x1xf32> to vector<8x8xf32>
    %304 = arith.subf %300, %303 : vector<8x8xf32>
    %305 = math.exp %304 : vector<8x8xf32>
    %cst_113 = arith.constant dense<0.000000e+00> : vector<8xf32>
    %306 = vector.multi_reduction <add>, %305, %cst_113 [1] : vector<8x8xf32> to vector<8xf32>
    %307 = vector.shape_cast %306 : vector<8xf32> to vector<8x1xf32>
    %308 = tpu.reciprocal %307 {approx = true} : vector<8x1xf32> -> vector<8x1xf32>
    %309 = vector.broadcast %308 : vector<8x1xf32> to vector<8x8xf32>
    %310 = arith.mulf %305, %309 : vector<8x8xf32>
    %cst_114 = arith.constant dense<0.000000e+00> : vector<8x8xf32>
    %311 = tpu.matmul %310, %297, %cst_114 {dimension_numbers = #tpu.dot_dimension_numbers<[1], [0], [0], [1], [0, 0, 1, 1], [], []>} : vector<8x8xf32>, vector<8x8xf32>, vector<8x8xf32> -> vector<8x8xf32>
    %312 = vector.extract_strided_slice %255 {offsets = [0, 24], sizes = [8, 8], strides = [1, 1]} : vector<8x32xf32> to vector<8x8xf32>
    %313 = vector.extract_strided_slice %260 {offsets = [0, 24], sizes = [8, 8], strides = [1, 1]} : vector<8x64xf32> to vector<8x8xf32>
    %314 = vector.extract_strided_slice %260 {offsets = [0, 56], sizes = [8, 8], strides = [1, 1]} : vector<8x64xf32> to vector<8x8xf32>
    %cst_115 = arith.constant dense<0.000000e+00> : vector<8x8xf32>
    %315 = tpu.matmul %312, %313, %cst_115 {dimension_numbers = #tpu.dot_dimension_numbers<[1], [1], [0], [0], [0, 0, 1, 0], [], []>} : vector<8x8xf32>, vector<8x8xf32>, vector<8x8xf32> -> vector<8x8xf32>
    %cst_116 = arith.constant 0.353553385 : f32
    %316 = vector.broadcast %cst_116 : f32 to vector<8x8xf32>
    %317 = arith.mulf %315, %316 : vector<8x8xf32>
    %cst_117 = arith.constant dense<0xFF800000> : vector<8xf32>
    %318 = vector.multi_reduction <maximumf>, %317, %cst_117 [1] : vector<8x8xf32> to vector<8xf32>
    %319 = vector.shape_cast %318 : vector<8xf32> to vector<8x1xf32>
    %320 = vector.broadcast %319 : vector<8x1xf32> to vector<8x8xf32>
    %321 = arith.subf %317, %320 : vector<8x8xf32>
    %322 = math.exp %321 : vector<8x8xf32>
    %cst_118 = arith.constant dense<0.000000e+00> : vector<8xf32>
    %323 = vector.multi_reduction <add>, %322, %cst_118 [1] : vector<8x8xf32> to vector<8xf32>
    %324 = vector.shape_cast %323 : vector<8xf32> to vector<8x1xf32>
    %325 = tpu.reciprocal %324 {approx = true} : vector<8x1xf32> -> vector<8x1xf32>
    %326 = vector.broadcast %325 : vector<8x1xf32> to vector<8x8xf32>
    %327 = arith.mulf %322, %326 : vector<8x8xf32>
    %cst_119 = arith.constant dense<0.000000e+00> : vector<8x8xf32>
    %328 = tpu.matmul %327, %314, %cst_119 {dimension_numbers = #tpu.dot_dimension_numbers<[1], [0], [0], [1], [0, 0, 1, 1], [], []>} : vector<8x8xf32>, vector<8x8xf32>, vector<8x8xf32> -> vector<8x8xf32>
    %329 = tpu.concatenate %277, %294, %311, %328 in 1 : vector<8x8xf32>, vector<8x8xf32>, vector<8x8xf32>, vector<8x8xf32> -> vector<8x32xf32>
    %c232 = arith.constant 232 : index
    %c0_120 = arith.constant 0 : index
    %330 = vector.load %arg3[%c232, %c0_120] : memref<424x32xf32, #tpu.memory_space<vmem>>, vector<32x32xf32>
    %cst_121 = arith.constant dense<0.000000e+00> : vector<8x32xf32>
    %331 = tpu.matmul %329, %330, %cst_121 {dimension_numbers = #tpu.dot_dimension_numbers<[1], [0], [0], [1], [0, 0, 1, 1], [], []>} : vector<8x32xf32>, vector<32x32xf32>, vector<8x32xf32> -> vector<8x32xf32>
    %c409 = arith.constant 409 : index
    %c0_122 = arith.constant 0 : index
    %332 = vector.load %arg3[%c409, %c0_122] : memref<424x32xf32, #tpu.memory_space<vmem>>, vector<1x32xf32>
    %333 = vector.broadcast %332 : vector<1x32xf32> to vector<8x32xf32>
    %334 = arith.addf %331, %333 : vector<8x32xf32>
    %335 = arith.addf %137, %334 : vector<8x32xf32>
    %c410 = arith.constant 410 : index
    %c0_123 = arith.constant 0 : index
    %336 = vector.load %arg3[%c410, %c0_123] : memref<424x32xf32, #tpu.memory_space<vmem>>, vector<1x32xf32>
    %c411 = arith.constant 411 : index
    %c0_124 = arith.constant 0 : index
    %337 = vector.load %arg3[%c411, %c0_124] : memref<424x32xf32, #tpu.memory_space<vmem>>, vector<1x32xf32>
    %cst_125 = arith.constant dense<0.000000e+00> : vector<8xf32>
    %338 = vector.multi_reduction <add>, %335, %cst_125 [1] : vector<8x32xf32> to vector<8xf32>
    %339 = vector.shape_cast %338 : vector<8xf32> to vector<8x1xf32>
    %cst_126 = arith.constant 3.200000e+01 : f32
    %340 = vector.broadcast %cst_126 : f32 to vector<8x1xf32>
    %341 = arith.divf %339, %340 : vector<8x1xf32>
    %342 = vector.broadcast %341 : vector<8x1xf32> to vector<8x32xf32>
    %343 = arith.subf %335, %342 : vector<8x32xf32>
    %344 = arith.mulf %343, %343 : vector<8x32xf32>
    %cst_127 = arith.constant dense<0.000000e+00> : vector<8xf32>
    %345 = vector.multi_reduction <add>, %344, %cst_127 [1] : vector<8x32xf32> to vector<8xf32>
    %346 = vector.shape_cast %345 : vector<8xf32> to vector<8x1xf32>
    %cst_128 = arith.constant 3.200000e+01 : f32
    %347 = vector.broadcast %cst_128 : f32 to vector<8x1xf32>
    %348 = arith.divf %346, %347 : vector<8x1xf32>
    %cst_129 = arith.constant 9.99999974E-6 : f32
    %349 = vector.broadcast %cst_129 : f32 to vector<8x1xf32>
    %350 = arith.addf %348, %349 : vector<8x1xf32>
    %351 = math.rsqrt %350 : vector<8x1xf32>
    %352 = vector.broadcast %351 : vector<8x1xf32> to vector<8x32xf32>
    %353 = arith.mulf %343, %352 : vector<8x32xf32>
    %354 = vector.broadcast %336 : vector<1x32xf32> to vector<8x32xf32>
    %355 = arith.mulf %353, %354 : vector<8x32xf32>
    %356 = vector.broadcast %337 : vector<1x32xf32> to vector<8x32xf32>
    %357 = arith.addf %355, %356 : vector<8x32xf32>
    %c413 = arith.constant 413 : index
    %c0_130 = arith.constant 0 : index
    %358 = vector.load %arg3[%c413, %c0_130] : memref<424x32xf32, #tpu.memory_space<vmem>>, vector<1x32xf32>
    %c414 = arith.constant 414 : index
    %c0_131 = arith.constant 0 : index
    %359 = vector.load %arg3[%c414, %c0_131] : memref<424x32xf32, #tpu.memory_space<vmem>>, vector<1x32xf32>
    %360 = tpu.concatenate %358, %359 in 1 : vector<1x32xf32>, vector<1x32xf32> -> vector<1x64xf32>
    %c136 = arith.constant 136 : index
    %c0_132 = arith.constant 0 : index
    %361 = vector.load %arg3[%c136, %c0_132] : memref<424x32xf32, #tpu.memory_space<vmem>>, vector<32x32xf32>
    %cst_133 = arith.constant dense<0.000000e+00> : vector<8x32xf32>
    %362 = tpu.matmul %247, %361, %cst_133 {dimension_numbers = #tpu.dot_dimension_numbers<[1], [0], [0], [1], [0, 0, 1, 1], [], []>} : vector<8x32xf32>, vector<32x32xf32>, vector<8x32xf32> -> vector<8x32xf32>
    %c412 = arith.constant 412 : index
    %c0_134 = arith.constant 0 : index
    %363 = vector.load %arg3[%c412, %c0_134] : memref<424x32xf32, #tpu.memory_space<vmem>>, vector<1x32xf32>
    %364 = vector.broadcast %363 : vector<1x32xf32> to vector<8x32xf32>
    %365 = arith.addf %362, %364 : vector<8x32xf32>
    %c3 = arith.constant 3 : index
    %c0_135 = arith.constant 0 : index
    %c0_136 = arith.constant 0 : index
    %366 = vector.load %arg2[%c3, %c0_135, %c0_136] : memref<4x32x64xf32, #tpu.memory_space<vmem>>, vector<1x32x64xf32>
    %367 = vector.shape_cast %366 : vector<1x32x64xf32> to vector<32x64xf32>
    %cst_137 = arith.constant dense<0.000000e+00> : vector<8x64xf32>
    %368 = tpu.matmul %357, %367, %cst_137 {dimension_numbers = #tpu.dot_dimension_numbers<[1], [0], [0], [1], [0, 0, 1, 1], [], []>} : vector<8x32xf32>, vector<32x64xf32>, vector<8x64xf32> -> vector<8x64xf32>
    %369 = vector.broadcast %360 : vector<1x64xf32> to vector<8x64xf32>
    %370 = arith.addf %368, %369 : vector<8x64xf32>
    %371 = vector.extract_strided_slice %365 {offsets = [0, 0], sizes = [8, 8], strides = [1, 1]} : vector<8x32xf32> to vector<8x8xf32>
    %372 = vector.extract_strided_slice %370 {offsets = [0, 0], sizes = [8, 8], strides = [1, 1]} : vector<8x64xf32> to vector<8x8xf32>
    %373 = vector.extract_strided_slice %370 {offsets = [0, 32], sizes = [8, 8], strides = [1, 1]} : vector<8x64xf32> to vector<8x8xf32>
    %cst_138 = arith.constant dense<0.000000e+00> : vector<8x8xf32>
    %374 = tpu.matmul %371, %372, %cst_138 {dimension_numbers = #tpu.dot_dimension_numbers<[1], [1], [0], [0], [0, 0, 1, 0], [], []>} : vector<8x8xf32>, vector<8x8xf32>, vector<8x8xf32> -> vector<8x8xf32>
    %cst_139 = arith.constant 0.353553385 : f32
    %375 = vector.broadcast %cst_139 : f32 to vector<8x8xf32>
    %376 = arith.mulf %374, %375 : vector<8x8xf32>
    %cst_140 = arith.constant dense<0xFF800000> : vector<8xf32>
    %377 = vector.multi_reduction <maximumf>, %376, %cst_140 [1] : vector<8x8xf32> to vector<8xf32>
    %378 = vector.shape_cast %377 : vector<8xf32> to vector<8x1xf32>
    %379 = vector.broadcast %378 : vector<8x1xf32> to vector<8x8xf32>
    %380 = arith.subf %376, %379 : vector<8x8xf32>
    %381 = math.exp %380 : vector<8x8xf32>
    %cst_141 = arith.constant dense<0.000000e+00> : vector<8xf32>
    %382 = vector.multi_reduction <add>, %381, %cst_141 [1] : vector<8x8xf32> to vector<8xf32>
    %383 = vector.shape_cast %382 : vector<8xf32> to vector<8x1xf32>
    %384 = tpu.reciprocal %383 {approx = true} : vector<8x1xf32> -> vector<8x1xf32>
    %385 = vector.broadcast %384 : vector<8x1xf32> to vector<8x8xf32>
    %386 = arith.mulf %381, %385 : vector<8x8xf32>
    %cst_142 = arith.constant dense<0.000000e+00> : vector<8x8xf32>
    %387 = tpu.matmul %386, %373, %cst_142 {dimension_numbers = #tpu.dot_dimension_numbers<[1], [0], [0], [1], [0, 0, 1, 1], [], []>} : vector<8x8xf32>, vector<8x8xf32>, vector<8x8xf32> -> vector<8x8xf32>
    %388 = vector.extract_strided_slice %365 {offsets = [0, 8], sizes = [8, 8], strides = [1, 1]} : vector<8x32xf32> to vector<8x8xf32>
    %389 = vector.extract_strided_slice %370 {offsets = [0, 8], sizes = [8, 8], strides = [1, 1]} : vector<8x64xf32> to vector<8x8xf32>
    %390 = vector.extract_strided_slice %370 {offsets = [0, 40], sizes = [8, 8], strides = [1, 1]} : vector<8x64xf32> to vector<8x8xf32>
    %cst_143 = arith.constant dense<0.000000e+00> : vector<8x8xf32>
    %391 = tpu.matmul %388, %389, %cst_143 {dimension_numbers = #tpu.dot_dimension_numbers<[1], [1], [0], [0], [0, 0, 1, 0], [], []>} : vector<8x8xf32>, vector<8x8xf32>, vector<8x8xf32> -> vector<8x8xf32>
    %cst_144 = arith.constant 0.353553385 : f32
    %392 = vector.broadcast %cst_144 : f32 to vector<8x8xf32>
    %393 = arith.mulf %391, %392 : vector<8x8xf32>
    %cst_145 = arith.constant dense<0xFF800000> : vector<8xf32>
    %394 = vector.multi_reduction <maximumf>, %393, %cst_145 [1] : vector<8x8xf32> to vector<8xf32>
    %395 = vector.shape_cast %394 : vector<8xf32> to vector<8x1xf32>
    %396 = vector.broadcast %395 : vector<8x1xf32> to vector<8x8xf32>
    %397 = arith.subf %393, %396 : vector<8x8xf32>
    %398 = math.exp %397 : vector<8x8xf32>
    %cst_146 = arith.constant dense<0.000000e+00> : vector<8xf32>
    %399 = vector.multi_reduction <add>, %398, %cst_146 [1] : vector<8x8xf32> to vector<8xf32>
    %400 = vector.shape_cast %399 : vector<8xf32> to vector<8x1xf32>
    %401 = tpu.reciprocal %400 {approx = true} : vector<8x1xf32> -> vector<8x1xf32>
    %402 = vector.broadcast %401 : vector<8x1xf32> to vector<8x8xf32>
    %403 = arith.mulf %398, %402 : vector<8x8xf32>
    %cst_147 = arith.constant dense<0.000000e+00> : vector<8x8xf32>
    %404 = tpu.matmul %403, %390, %cst_147 {dimension_numbers = #tpu.dot_dimension_numbers<[1], [0], [0], [1], [0, 0, 1, 1], [], []>} : vector<8x8xf32>, vector<8x8xf32>, vector<8x8xf32> -> vector<8x8xf32>
    %405 = vector.extract_strided_slice %365 {offsets = [0, 16], sizes = [8, 8], strides = [1, 1]} : vector<8x32xf32> to vector<8x8xf32>
    %406 = vector.extract_strided_slice %370 {offsets = [0, 16], sizes = [8, 8], strides = [1, 1]} : vector<8x64xf32> to vector<8x8xf32>
    %407 = vector.extract_strided_slice %370 {offsets = [0, 48], sizes = [8, 8], strides = [1, 1]} : vector<8x64xf32> to vector<8x8xf32>
    %cst_148 = arith.constant dense<0.000000e+00> : vector<8x8xf32>
    %408 = tpu.matmul %405, %406, %cst_148 {dimension_numbers = #tpu.dot_dimension_numbers<[1], [1], [0], [0], [0, 0, 1, 0], [], []>} : vector<8x8xf32>, vector<8x8xf32>, vector<8x8xf32> -> vector<8x8xf32>
    %cst_149 = arith.constant 0.353553385 : f32
    %409 = vector.broadcast %cst_149 : f32 to vector<8x8xf32>
    %410 = arith.mulf %408, %409 : vector<8x8xf32>
    %cst_150 = arith.constant dense<0xFF800000> : vector<8xf32>
    %411 = vector.multi_reduction <maximumf>, %410, %cst_150 [1] : vector<8x8xf32> to vector<8xf32>
    %412 = vector.shape_cast %411 : vector<8xf32> to vector<8x1xf32>
    %413 = vector.broadcast %412 : vector<8x1xf32> to vector<8x8xf32>
    %414 = arith.subf %410, %413 : vector<8x8xf32>
    %415 = math.exp %414 : vector<8x8xf32>
    %cst_151 = arith.constant dense<0.000000e+00> : vector<8xf32>
    %416 = vector.multi_reduction <add>, %415, %cst_151 [1] : vector<8x8xf32> to vector<8xf32>
    %417 = vector.shape_cast %416 : vector<8xf32> to vector<8x1xf32>
    %418 = tpu.reciprocal %417 {approx = true} : vector<8x1xf32> -> vector<8x1xf32>
    %419 = vector.broadcast %418 : vector<8x1xf32> to vector<8x8xf32>
    %420 = arith.mulf %415, %419 : vector<8x8xf32>
    %cst_152 = arith.constant dense<0.000000e+00> : vector<8x8xf32>
    %421 = tpu.matmul %420, %407, %cst_152 {dimension_numbers = #tpu.dot_dimension_numbers<[1], [0], [0], [1], [0, 0, 1, 1], [], []>} : vector<8x8xf32>, vector<8x8xf32>, vector<8x8xf32> -> vector<8x8xf32>
    %422 = vector.extract_strided_slice %365 {offsets = [0, 24], sizes = [8, 8], strides = [1, 1]} : vector<8x32xf32> to vector<8x8xf32>
    %423 = vector.extract_strided_slice %370 {offsets = [0, 24], sizes = [8, 8], strides = [1, 1]} : vector<8x64xf32> to vector<8x8xf32>
    %424 = vector.extract_strided_slice %370 {offsets = [0, 56], sizes = [8, 8], strides = [1, 1]} : vector<8x64xf32> to vector<8x8xf32>
    %cst_153 = arith.constant dense<0.000000e+00> : vector<8x8xf32>
    %425 = tpu.matmul %422, %423, %cst_153 {dimension_numbers = #tpu.dot_dimension_numbers<[1], [1], [0], [0], [0, 0, 1, 0], [], []>} : vector<8x8xf32>, vector<8x8xf32>, vector<8x8xf32> -> vector<8x8xf32>
    %cst_154 = arith.constant 0.353553385 : f32
    %426 = vector.broadcast %cst_154 : f32 to vector<8x8xf32>
    %427 = arith.mulf %425, %426 : vector<8x8xf32>
    %cst_155 = arith.constant dense<0xFF800000> : vector<8xf32>
    %428 = vector.multi_reduction <maximumf>, %427, %cst_155 [1] : vector<8x8xf32> to vector<8xf32>
    %429 = vector.shape_cast %428 : vector<8xf32> to vector<8x1xf32>
    %430 = vector.broadcast %429 : vector<8x1xf32> to vector<8x8xf32>
    %431 = arith.subf %427, %430 : vector<8x8xf32>
    %432 = math.exp %431 : vector<8x8xf32>
    %cst_156 = arith.constant dense<0.000000e+00> : vector<8xf32>
    %433 = vector.multi_reduction <add>, %432, %cst_156 [1] : vector<8x8xf32> to vector<8xf32>
    %434 = vector.shape_cast %433 : vector<8xf32> to vector<8x1xf32>
    %435 = tpu.reciprocal %434 {approx = true} : vector<8x1xf32> -> vector<8x1xf32>
    %436 = vector.broadcast %435 : vector<8x1xf32> to vector<8x8xf32>
    %437 = arith.mulf %432, %436 : vector<8x8xf32>
    %cst_157 = arith.constant dense<0.000000e+00> : vector<8x8xf32>
    %438 = tpu.matmul %437, %424, %cst_157 {dimension_numbers = #tpu.dot_dimension_numbers<[1], [0], [0], [1], [0, 0, 1, 1], [], []>} : vector<8x8xf32>, vector<8x8xf32>, vector<8x8xf32> -> vector<8x8xf32>
    %439 = tpu.concatenate %387, %404, %421, %438 in 1 : vector<8x8xf32>, vector<8x8xf32>, vector<8x8xf32>, vector<8x8xf32> -> vector<8x32xf32>
    %c264 = arith.constant 264 : index
    %c0_158 = arith.constant 0 : index
    %440 = vector.load %arg3[%c264, %c0_158] : memref<424x32xf32, #tpu.memory_space<vmem>>, vector<32x32xf32>
    %cst_159 = arith.constant dense<0.000000e+00> : vector<8x32xf32>
    %441 = tpu.matmul %439, %440, %cst_159 {dimension_numbers = #tpu.dot_dimension_numbers<[1], [0], [0], [1], [0, 0, 1, 1], [], []>} : vector<8x32xf32>, vector<32x32xf32>, vector<8x32xf32> -> vector<8x32xf32>
    %c415 = arith.constant 415 : index
    %c0_160 = arith.constant 0 : index
    %442 = vector.load %arg3[%c415, %c0_160] : memref<424x32xf32, #tpu.memory_space<vmem>>, vector<1x32xf32>
    %443 = vector.broadcast %442 : vector<1x32xf32> to vector<8x32xf32>
    %444 = arith.addf %441, %443 : vector<8x32xf32>
    %445 = arith.addf %247, %444 : vector<8x32xf32>
    %c416 = arith.constant 416 : index
    %c0_161 = arith.constant 0 : index
    %446 = vector.load %arg3[%c416, %c0_161] : memref<424x32xf32, #tpu.memory_space<vmem>>, vector<1x32xf32>
    %c417 = arith.constant 417 : index
    %c0_162 = arith.constant 0 : index
    %447 = vector.load %arg3[%c417, %c0_162] : memref<424x32xf32, #tpu.memory_space<vmem>>, vector<1x32xf32>
    %cst_163 = arith.constant dense<0.000000e+00> : vector<8xf32>
    %448 = vector.multi_reduction <add>, %445, %cst_163 [1] : vector<8x32xf32> to vector<8xf32>
    %449 = vector.shape_cast %448 : vector<8xf32> to vector<8x1xf32>
    %cst_164 = arith.constant 3.200000e+01 : f32
    %450 = vector.broadcast %cst_164 : f32 to vector<8x1xf32>
    %451 = arith.divf %449, %450 : vector<8x1xf32>
    %452 = vector.broadcast %451 : vector<8x1xf32> to vector<8x32xf32>
    %453 = arith.subf %445, %452 : vector<8x32xf32>
    %454 = arith.mulf %453, %453 : vector<8x32xf32>
    %cst_165 = arith.constant dense<0.000000e+00> : vector<8xf32>
    %455 = vector.multi_reduction <add>, %454, %cst_165 [1] : vector<8x32xf32> to vector<8xf32>
    %456 = vector.shape_cast %455 : vector<8xf32> to vector<8x1xf32>
    %cst_166 = arith.constant 3.200000e+01 : f32
    %457 = vector.broadcast %cst_166 : f32 to vector<8x1xf32>
    %458 = arith.divf %456, %457 : vector<8x1xf32>
    %cst_167 = arith.constant 9.99999974E-6 : f32
    %459 = vector.broadcast %cst_167 : f32 to vector<8x1xf32>
    %460 = arith.addf %458, %459 : vector<8x1xf32>
    %461 = math.rsqrt %460 : vector<8x1xf32>
    %462 = vector.broadcast %461 : vector<8x1xf32> to vector<8x32xf32>
    %463 = arith.mulf %453, %462 : vector<8x32xf32>
    %464 = vector.broadcast %446 : vector<1x32xf32> to vector<8x32xf32>
    %465 = arith.mulf %463, %464 : vector<8x32xf32>
    %466 = vector.broadcast %447 : vector<1x32xf32> to vector<8x32xf32>
    %467 = arith.addf %465, %466 : vector<8x32xf32>
    %468 = tpu.concatenate %357, %467 in 1 : vector<8x32xf32>, vector<8x32xf32> -> vector<8x64xf32>
    %c296 = arith.constant 296 : index
    %c0_168 = arith.constant 0 : index
    %469 = vector.load %arg3[%c296, %c0_168] : memref<424x32xf32, #tpu.memory_space<vmem>>, vector<64x32xf32>
    %cst_169 = arith.constant dense<0.000000e+00> : vector<8x32xf32>
    %470 = tpu.matmul %468, %469, %cst_169 {dimension_numbers = #tpu.dot_dimension_numbers<[1], [0], [0], [1], [0, 0, 1, 1], [], []>} : vector<8x64xf32>, vector<64x32xf32>, vector<8x32xf32> -> vector<8x32xf32>
    %c418 = arith.constant 418 : index
    %c0_170 = arith.constant 0 : index
    %471 = vector.load %arg3[%c418, %c0_170] : memref<424x32xf32, #tpu.memory_space<vmem>>, vector<1x32xf32>
    %472 = vector.broadcast %471 : vector<1x32xf32> to vector<8x32xf32>
    %473 = arith.addf %470, %472 : vector<8x32xf32>
    %474 = arith.negf %473 : vector<8x32xf32>
    %475 = math.exp %474 : vector<8x32xf32>
    %cst_171 = arith.constant 1.000000e+00 : f32
    %476 = vector.broadcast %cst_171 : f32 to vector<8x32xf32>
    %477 = arith.addf %476, %475 : vector<8x32xf32>
    %478 = arith.divf %476, %477 : vector<8x32xf32>
    %479 = arith.mulf %478, %357 : vector<8x32xf32>
    %cst_172 = arith.constant 1.000000e+00 : f32
    %480 = vector.broadcast %cst_172 : f32 to vector<8x32xf32>
    %481 = arith.subf %480, %478 : vector<8x32xf32>
    %482 = arith.mulf %481, %467 : vector<8x32xf32>
    %483 = arith.addf %479, %482 : vector<8x32xf32>
    %c360 = arith.constant 360 : index
    %c0_173 = arith.constant 0 : index
    %484 = vector.load %arg3[%c360, %c0_173] : memref<424x32xf32, #tpu.memory_space<vmem>>, vector<32x32xf32>
    %cst_174 = arith.constant dense<0.000000e+00> : vector<8x32xf32>
    %485 = tpu.matmul %483, %484, %cst_174 {dimension_numbers = #tpu.dot_dimension_numbers<[1], [0], [0], [1], [0, 0, 1, 1], [], []>} : vector<8x32xf32>, vector<32x32xf32>, vector<8x32xf32> -> vector<8x32xf32>
    %c419 = arith.constant 419 : index
    %c0_175 = arith.constant 0 : index
    %486 = vector.load %arg3[%c419, %c0_175] : memref<424x32xf32, #tpu.memory_space<vmem>>, vector<1x32xf32>
    %487 = vector.broadcast %486 : vector<1x32xf32> to vector<8x32xf32>
    %488 = arith.addf %485, %487 : vector<8x32xf32>
    %489 = arith.addf %488, %357 : vector<8x32xf32>
    %490 = arith.addf %489, %467 : vector<8x32xf32>
    %c420 = arith.constant 420 : index
    %c0_176 = arith.constant 0 : index
    %491 = vector.load %arg3[%c420, %c0_176] : memref<424x32xf32, #tpu.memory_space<vmem>>, vector<1x32xf32>
    %c421 = arith.constant 421 : index
    %c0_177 = arith.constant 0 : index
    %492 = vector.load %arg3[%c421, %c0_177] : memref<424x32xf32, #tpu.memory_space<vmem>>, vector<1x32xf32>
    %cst_178 = arith.constant dense<0.000000e+00> : vector<8xf32>
    %493 = vector.multi_reduction <add>, %490, %cst_178 [1] : vector<8x32xf32> to vector<8xf32>
    %494 = vector.shape_cast %493 : vector<8xf32> to vector<8x1xf32>
    %cst_179 = arith.constant 3.200000e+01 : f32
    %495 = vector.broadcast %cst_179 : f32 to vector<8x1xf32>
    %496 = arith.divf %494, %495 : vector<8x1xf32>
    %497 = vector.broadcast %496 : vector<8x1xf32> to vector<8x32xf32>
    %498 = arith.subf %490, %497 : vector<8x32xf32>
    %499 = arith.mulf %498, %498 : vector<8x32xf32>
    %cst_180 = arith.constant dense<0.000000e+00> : vector<8xf32>
    %500 = vector.multi_reduction <add>, %499, %cst_180 [1] : vector<8x32xf32> to vector<8xf32>
    %501 = vector.shape_cast %500 : vector<8xf32> to vector<8x1xf32>
    %cst_181 = arith.constant 3.200000e+01 : f32
    %502 = vector.broadcast %cst_181 : f32 to vector<8x1xf32>
    %503 = arith.divf %501, %502 : vector<8x1xf32>
    %cst_182 = arith.constant 9.99999974E-6 : f32
    %504 = vector.broadcast %cst_182 : f32 to vector<8x1xf32>
    %505 = arith.addf %503, %504 : vector<8x1xf32>
    %506 = math.rsqrt %505 : vector<8x1xf32>
    %507 = vector.broadcast %506 : vector<8x1xf32> to vector<8x32xf32>
    %508 = arith.mulf %498, %507 : vector<8x32xf32>
    %509 = vector.broadcast %491 : vector<1x32xf32> to vector<8x32xf32>
    %510 = arith.mulf %508, %509 : vector<8x32xf32>
    %511 = vector.broadcast %492 : vector<1x32xf32> to vector<8x32xf32>
    %512 = arith.addf %510, %511 : vector<8x32xf32>
    %c0_183 = arith.constant 0 : index
    %c0_184 = arith.constant 0 : index
    %513 = vector.load %arg4[%c0_183, %c0_184] : memref<8x32xf32, #tpu.memory_space<vmem>>, vector<8x32xf32>
    tpu.vector_store %arg4[%c0_183, %c0_184], %512 {strides = array<i32>} : memref<8x32xf32, #tpu.memory_space<vmem>>, vector<8x32xf32>,
    return
  }
}

</mosaic_0001>

<bundles_post_ra>
// kernel: tpu_custom_call.1
= control target key start
LH: loop header
LB: loop body
LE: loop exit
PB: predicated region body
PF: predicated region fallthrough
CT: control target
= control target key end

     0   :  { %v4936_v2 = vmov 0.0   ;;  %vm26_vm0 = vcmask 130048   ;;  %s5713_s0 = inlined_call_operand.vmem [shape: f32[8,16], index: 0, kind: input, shape index: {}]   ;;  %s5714_s1 = inlined_call_operand.vmem [shape: f32[8,24], index: 1, kind: input, shape index: {}]   ;;  %s5715_s2 = inlined_call_operand.vmem [shape: f32[4,32,64], index: 2, kind: input, shape index: {}]   ;;  %s5716_s3 = inlined_call_operand.vmem [shape: f32[424,32], index: 3, kind: input, shape index: {}]   ;;  %s5717_s4 = inlined_call_operand.hbm [shape: f32[8,32], index: 4, kind: output, shape index: {}]  }
   0x1   :  { %v20_v0 = vld [vmem:[%s5716_s3 + $0x8] sm:$0xff]  ;;  %v108_v1 = vld [vmem:[%s5716_s3 + $0x20] sm:$0xff]  ;;  %4480 = vmatprep.subr.mxu0 %v4936_v2  ;;  %4487 = vmatprep.subr.mxu1 %v4936_v2  ;;  %v107_v4 = vld [vmem:[%s5716_s3 + $0x18] sm:$0xff] }
   0x2   :  { %v19_v3 = vld [vmem:[%s5716_s3] sm:$0xff]  ;;  %4481 = vmatpush3.msra.mxu0 %v20_v0  ;;  %4488 = vmatpush3.msra.mxu1 %v108_v1 }
   0x3   :  { %v18_v5 = vld [vmem:[%s5713_s0] sm:$0xff] }
   0x4   :  { %9 = vsyncpa [#allocation3], 0  ;;  %4482 = vmatprep.subr.mxu0 %v4936_v2  ;;  %4489 = vmatprep.subr.mxu1 %v4936_v2  ;;  %vm4937_vm1 = vmmov 0   ;;  %v106_v6 = vld [vmem:[%s5716_s3 + $0x10] sm:$0xff]  ;;  %v105_v7 = vld [vmem:[%s5714_s1] sm:$0xff]  ;;  %vm114_vm2 = vcmask 195584   ;;  %v287_v35 = vlaneseq }
   0x5   :  { %4483 = vmatpush3.msra.mxu0 %v19_v3  ;;  %4484 = vmatprep.mubr.msk.f32.mxu0 %vm4937_vm1, %v4936_v2  ;;  %v204_v8 = vld [vmem:[%s5716_s3 + $0x40] sm:$0xff]  ;;  %v203_v9 = vld [vmem:[%s5716_s3 + $0x38] sm:$0xff]  ;;  %v202_v11 = vld [vmem:[%s5716_s3 + $0x30] sm:$0xff]  ;;  %s4938_s19 = smov 32   ;;  %vm199_vm3 = vcmask 261120   ;;  %s4939_s0 = smov 120  }
   0x6   :  { %4490 = vmatpush3.msra.mxu1 %v107_v4  ;;  %4485 = vmatmul.mubr.msk.f32.vlgmr.msra.gmra.mxu0 %vm26_vm0, %v18_v5  ;;  %v286_v10 = vld [vmem:[%s5715_s2 + $0x18] sm:$0xff]  ;;  %v285_v12 = vld [vmem:[%s5715_s2 + $0x10] sm:$0xff]  ;;  %v201_v13 = vld [vmem:[%s5716_s3 + $0x28] sm:$0xff]  ;;  %v288_v36 = vshrl.u32 %v287_v35, 7  ;;  %vm364_vm4 = vcmask 64512   ;;  %s4940_s1 = smov 112  }
   0x7   :  { %4491 = vmatprep.subr.mxu1 %v4936_v2  ;;  %4493 = vmatprep.mubr.msk.f32.mxu1 %vm4937_vm1, %v4936_v2  ;;  %v284_v14 = vld [vmem:[%s5715_s2 + $0x8] sm:$0xff]  ;;  %v283_v15 = vld [vmem:[%s5715_s2] sm:$0xff]  ;;  %s4941_s28 = smov 104   ;;  %s4942_s29 = smov 88   ;;  %vm4028_vm5 = vcmask 523264  }
   0x8   :  { %4492 = vmatpush3.msra.mxu1 %v106_v6  ;;  %4496 = vmatprep.subr.mxu0 %v4936_v2  ;;  %v194_v16 = vld [vmem:[%s5716_s3 + $0x18c] sm:$0x1]  ;;  %v4236_v17 = vld [vmem:[%s5716_s3 + $0x188] ss:$0 sm:$0xff]  ;;  %v4238_v20 = vld [vmem:[%s5716_s3 + $0x189] ss:$0 sm:$0xff] }
   0x9   :  { %4494 = vmatmul.mubr.msk.f32.vlgmr.msra.gmra.mxu1 %vm114_vm2, %v105_v7  ;;  %4507 = vmatprep.subr.mxu1 %v4936_v2  ;;  %v193_v38 = vld [vmem:[%s5716_s3 + $0x18b] sm:$0x1]  ;;  %v5070_v39 = vsub.s32 0, %v288_v36  ;;  %v4240_v41 = vld [vmem:[%s5716_s3 + $0x18a] ss:$0 sm:$0xff]  ;;  %s4943_s30 = smov 96  }
   0xa   :  { %4504 = vmatprep.mubr.msk.f32.mxu0 %vm4937_vm1, %v4936_v2  ;;  %4515 = vmatprep.mubr.msk.f32.mxu1 %vm4937_vm1, %v4936_v2  ;;  %s4944_s5 = smov 80   ;;  %s4945_s6 = smov 72  }
   0xb   :  { %4497 = vmatpush3.msra.mxu0 %v204_v8  ;;  %4508 = vmatpush3.msra.mxu1 %v286_v10  ;;  %s4946_s24 = smov 8   ;;  %s4947_s25 = smov 16  }
   0xc   :  { %4498 = vmatprep.subr.mxu0 %v4936_v2  ;;  %4509 = vmatprep.subr.mxu1 %v4936_v2  ;;  %s4948_s26 = smov 24   ;;  %s4949_s20 = smov [#allocation2]  }
   0xd   :  { %4499 = vmatpush3.msra.mxu0 %v203_v9  ;;  %4510 = vmatpush3.msra.mxu1 %v285_v12  ;;  %s4228_s21 = sshll.u32 %s4949_s20, 4  ;;  %s4229_s21 = int_to_ptr.vmem [resolvable:$true] %s4228_s21 }
   0xe   :  { %4500 = vmatprep.subr.mxu0 %v4936_v2  ;;  %4511 = vmatprep.subr.mxu1 %v4936_v2  ;;  %s4914_s22 = scalar_lea.vmem %s4229_s21, 128  ;;  %p4919_p1 = scmp.lt.s32.totalorder %s4229_s21, %s4229_s21 }
   0xf   :  { %4501 = vmatpush3.msra.mxu0 %v202_v11  ;;  %4512 = vmatpush3.msra.mxu1 %v284_v14  ;;  %p4915_p0 = scmp.ne.s32.totalorder %s4229_s21, %s4914_s22  ;;  %p4920_p2 = scmp.lt.s32.totalorder %s4914_s22, %s4914_s22 }
  0x10   :  { %4502 = vmatprep.subr.mxu0 %v4936_v2  ;;  %4513 = vmatprep.subr.mxu1 %v4936_v2 }
  0x11   :  { %4503 = vmatpush3.msra.mxu0 %v201_v13  ;;  %4514 = vmatpush3.msra.mxu1 %v283_v15  ;;  %p4921_p3 = por %p4920_p2, %p4919_p1 }
  0x12   :  { %4518 = vmatprep.subr.mxu0 %v4936_v2  ;;  %4523 = vmatprep.subr.mxu1 %v4936_v2 }
  0x13   :  { %196 = vrot.lane.b32.xlu0 %v194_v16, %s4938_s19  ;;  %p4922_p4 = pnand %p4921_p3, %p4915_p0 }
  0x85   :  { %v197_v37 = vpop.permute.xlu0 %196 }
  0x86   :  { %v200_v40 = vsel %vm199_vm3, %v193_v38, %v197_v37 }
  0x87   :  { %v290_v43 = vrot.slane %v200_v40, %v5070_v39 }
  0xc6   :  { %v96_v18 = vpop.f32.mrf.mxu0 }
  0xc7   :  { %v97_v19 = vadd.f32 %v4236_v17, %v96_v18 }
  0xc8   :  { %v4486_v21 = vpop.f32.mrf.mxu0 }
  0xc9   :  { %v101_v22 = vmul.f32 0.70710677, %v97_v19  ;;  %v184_v23 = vpop.f32.mrf.mxu1  ;;  %v100_v28 = vmul.f32 0.5, %v97_v19 }
  0xca   :  { %v185_v24 = vadd.f32 %v4238_v20, %v184_v23 }
  0xcb   :  { %4832 = verf.f32 %v101_v22  ;;  %v4495_v25 = vpop.f32.mrf.mxu1 }
  0xcc   :  { %v189_v26 = vmul.f32 0.70710677, %v185_v24  ;;  %v188_v32 = vmul.f32 0.5, %v185_v24 }
  0xce   :  { %4834 = verf.f32 %v189_v26 }
  0xd8   :  { %v4833_v27 = vpop.eup %4832 }
  0xd9   :  { %v103_v29 = vadd.f32 1.0, %v4833_v27 }
  0xdb   :  { %v4835_v30 = vpop.eup %4834  ;;  %v5055_v31 = vmul.f32 %v103_v29, %v100_v28 }
  0xdc   :  { %v191_v33 = vadd.f32 1.0, %v4835_v30 }
  0xdd   :  { %4505 = vmatmul.mubr.msk.f32.vlgmr.msra.gmra.mxu0 %vm199_vm3, %v5055_v31 }
  0xde   :  { %v5059_v34 = vmul.f32 %v191_v33, %v188_v32  ;;  %4520 = vmatprep.mubr.msk.f32.mxu0 %vm4937_vm1, %v4936_v2 }
  0xe0   :  { %4516 = vmatmul.mubr.msk.f32.vlgmr.msra.gmra.mxu1 %vm199_vm3, %v5059_v34 }
  0xe1   :  { %4525 = vmatprep.mubr.msk.f32.mxu1 %vm4937_vm1, %v4936_v2 }
 0x19d   :  { %v279_v42 = vpop.f32.mrf.mxu0 }
 0x19e   :  { %v280_v44 = vadd.f32 %v4240_v41, %v279_v42 }
 0x19f   :  { %v4506_v45 = vpop.f32.mrf.mxu0 }
 0x1a0   :  { %v360_v46 = vpop.f32.mrf.mxu1  ;;  %529 = vrot.lane.b32.xlu1 %v280_v44, %s4939_s0 }
 0x1a1   :  { %v5078_v47 = vadd.f32 %v360_v46, %v290_v43 }
 0x1a2   :  { %v4517_v48 = vpop.f32.mrf.mxu1 }
 0x1a3   :  { %531 = vrot.lane.b32.xlu0 %v5078_v47, %s4939_s0  ;;  %4519 = vmatpush3.xpose.msk.msra.mxu0 %vm364_vm4, %v5078_v47  ;;  %v1160_v48 = vld [vmem:[%s5716_s3 + $0x58] sm:$0xff] }
 0x1a4   :  { %697 = vrot.lane.b32.xlu1 %v5078_v47, %s4940_s1  ;;  %4528 = vmatprep.subr.mxu0 %v4936_v2 }
 0x1a6   :  { %4521 = vmatmul.mubr.msk.f32.vlgmr.msra.gmra.mxu0 %vm364_vm4, %v280_v44 }
 0x1a7   :  { %695 = vrot.lane.b32.xlu0 %v280_v44, %s4940_s1  ;;  %4530 = vmatprep.mubr.msk.f32.mxu0 %vm4937_vm1, %v4936_v2 }
 0x1a8   :  { %863 = vrot.lane.b32.xlu1 %v5078_v47, %s4941_s28 }
 0x1ab   :  { %861 = vrot.lane.b32.xlu0 %v280_v44, %s4941_s28 }
 0x212   :  { %v530_v49 = vpop.permute.xlu1 %529 }
 0x215   :  { %v532_v50 = vpop.permute.xlu0 %531 }
 0x216   :  { %4529 = vmatpush3.xpose.msk.msra.mxu0 %vm364_vm4, %v532_v50  ;;  %v698_v51 = vpop.permute.xlu1 %697  ;;  %v1158_v50 = vld [vmem:[%s5716_s3 + $0x48] sm:$0xff] }
 0x217   :  { %4538 = vmatprep.subr.mxu0 %v4936_v2 }
 0x219   :  { %4531 = vmatmul.mubr.msk.f32.vlgmr.msra.gmra.mxu0 %vm364_vm4, %v530_v49  ;;  %v696_v52 = vpop.permute.xlu0 %695  ;;  %v1159_v49 = vld [vmem:[%s5716_s3 + $0x50] sm:$0xff] }
 0x21a   :  { %4539 = vmatpush3.xpose.msk.msra.mxu0 %vm364_vm4, %v698_v51  ;;  %4540 = vmatprep.mubr.msk.f32.mxu0 %vm4937_vm1, %v4936_v2  ;;  %v864_v53 = vpop.permute.xlu1 %863 }
 0x21b   :  { %4548 = vmatprep.subr.mxu0 %v4936_v2 }
 0x21d   :  { %4541 = vmatmul.mubr.msk.f32.vlgmr.msra.gmra.mxu0 %vm364_vm4, %v696_v52  ;;  %v862_v54 = vpop.permute.xlu0 %861 }
 0x21e   :  { %4549 = vmatpush3.xpose.msk.msra.mxu0 %vm364_vm4, %v864_v53  ;;  %4550 = vmatprep.mubr.msk.f32.mxu0 %vm4937_vm1, %v4936_v2  ;;  %v1045_v53 = vld [vmem:[%s5716_s3 + $0xc0] sm:$0xff] }
 0x21f   :  { %4558 = vmatprep.subr.mxu0 %v4936_v2 }
 0x221   :  { %4551 = vmatmul.mubr.msk.f32.vlgmr.msra.gmra.mxu0 %vm364_vm4, %v862_v54  ;;  %v1044_v54 = vld [vmem:[%s5716_s3 + $0xb8] sm:$0xff] }
 0x222   :  { %4566 = vmatprep.mubr.msk.f32.mxu0 %vm4937_vm1, %v4936_v2  ;;  %4559 = vmatpush3.msra.mxu0 %v1045_v53 }
 0x223   :  { %4560 = vmatprep.subr.mxu0 %v4936_v2 }
 0x224   :  { %4561 = vmatpush3.msra.mxu0 %v1044_v54 }
 0x225   :  { %4562 = vmatprep.subr.mxu0 %v4936_v2 }
 0x266   :  { %v437_v55 = vpop.f32.mrf.mxu0 }
 0x267   :  { %v441_v56 = vmul.f32 0.35355338, %v437_v55  ;;  %v1043_v55 = vld [vmem:[%s5716_s3 + $0xb0] sm:$0xff] }
 0x268   :  { %v4522_v57 = vpop.f32.mrf.mxu0  ;;  %4563 = vmatpush3.msra.mxu0 %v1043_v55 }
 0x269   :  { %v442_v58 = vsel %vm364_vm4, %v441_v56, -inf  ;;  %4564 = vmatprep.subr.mxu0 %v4936_v2 }
 0x26a   :  { %443 = vmax.xlane.f32.xlu1 %v442_v58 }
 0x2d9   :  { %v603_v59 = vpop.f32.mrf.mxu0 }
 0x2da   :  { %v607_v60 = vmul.f32 0.35355338, %v603_v59 }
 0x2db   :  { %v4532_v61 = vpop.f32.mrf.mxu0 }
 0x2dc   :  { %v608_v62 = vsel %vm364_vm4, %v607_v60, -inf }
 0x2dd   :  { %609 = vmax.xlane.f32.xlu0 %v608_v62  ;;  %v769_v63 = vpop.f32.mrf.mxu0 }
 0x2de   :  { %v773_v0 = vmul.f32 0.35355338, %v769_v63 }
 0x2df   :  { %v4542_v1 = vpop.f32.mrf.mxu0 }
 0x2e0   :  { %v774_v3 = vsel %vm364_vm4, %v773_v0, -inf }
 0x2e1   :  { %775 = vmax.xlane.f32.xlu0 %v774_v3  ;;  %v935_v4 = vpop.f32.mrf.mxu0 }
 0x2e2   :  { %v939_v5 = vmul.f32 0.35355338, %v935_v4 }
 0x2e3   :  { %v4552_v6 = vpop.f32.mrf.mxu0 }
 0x2e4   :  { %v940_v7 = vsel %vm364_vm4, %v939_v5, -inf }
 0x2e5   :  { %941 = vmax.xlane.f32.xlu1 %v940_v7 }
 0x2f3   :  { %v444_v8 = vpop.xlane.xlu1 %443 }
 0x2f4   :  { %v445_v9 = vsub.f32 %v441_v56, %v444_v8  ;;  %v1042_v56 = vld [vmem:[%s5716_s3 + $0xa8] sm:$0xff] }
 0x2f5   :  { %4565 = vmatpush3.msra.mxu0 %v1042_v56  ;;  %v4255_v8 = vld [vmem:[%s5716_s3 + $0x18d] ss:$0 sm:$0xff] }
 0x2f6   :  { %v446_v10 = vmul.f32 1.442695, %v445_v9  ;;  %619 = vrot.lane.b32.xlu1 %v5078_v47, %s4942_s29  ;;  %4580 = vmatprep.subr.mxu0 %v4936_v2 }
 0x2f8   :  { %4836 = vpow2.f32 %v446_v10 }
 0x305   :  { %v4837_v11 = vpop.eup %4836 }
 0x306   :  { %v448_v12 = vsel %vm364_vm4, %v4837_v11, 0.0 }
 0x307   :  { %449 = vadd.xlane.f32.xlu0 %v448_v12 }
 0x31d   :  { %453 = vrot.lane.b32.xlu0 %v5078_v47, %s4943_s30 }
 0x366   :  { %v610_v13 = vpop.xlane.xlu0 %609 }
 0x367   :  { %v611_v14 = vsub.f32 %v607_v60, %v610_v13 }
 0x369   :  { %v612_v15 = vmul.f32 1.442695, %v611_v14  ;;  %v1152_v14 = vld [vmem:[%s5716_s3 + $0x192] sm:$0x1] }
 0x36a   :  { %v776_v16 = vpop.xlane.xlu0 %775 }
 0x36b   :  { %4838 = vpow2.f32 %v612_v15  ;;  %v777_v17 = vsub.f32 %v773_v0, %v776_v16  ;;  %v4259_v15 = vld [vmem:[%s5716_s3 + $0x190] ss:$0 sm:$0xff] }
 0x36d   :  { %v778_v18 = vmul.f32 1.442695, %v777_v17 }
 0x36e   :  { %v942_v19 = vpop.xlane.xlu1 %941 }
 0x36f   :  { %4840 = vpow2.f32 %v778_v18  ;;  %v943_v20 = vsub.f32 %v939_v5, %v942_v19 }
 0x371   :  { %v944_v21 = vmul.f32 1.442695, %v943_v20 }
 0x372   :  { %v620_v33 = vpop.permute.xlu1 %619 }
 0x373   :  { %4842 = vpow2.f32 %v944_v21  ;;  %v4264_v21 = vld [vmem:[%s5715_s2 + $0x38] sm:$0xff] }
 0x378   :  { %v4839_v22 = vpop.eup %4838 }
 0x379   :  { %v614_v23 = vsel %vm364_vm4, %v4839_v22, 0.0 }
 0x37a   :  { %615 = vadd.xlane.f32.xlu1 %v614_v23  ;;  %v4262_v23 = vld [vmem:[%s5715_s2 + $0x28] sm:$0xff] }
 0x37c   :  { %v4841_v24 = vpop.eup %4840 }
 0x37d   :  { %v780_v25 = vsel %vm364_vm4, %v4841_v24, 0.0 }
 0x37e   :  { %781 = vadd.xlane.f32.xlu0 %v780_v25 }
 0x380   :  { %v4843_v26 = vpop.eup %4842 }
 0x381   :  { %v946_v27 = vsel %vm364_vm4, %v4843_v26, 0.0 }
 0x382   :  { %947 = vadd.xlane.f32.xlu1 %v946_v27 }
 0x390   :  { %v450_v28 = vpop.xlane.xlu0 %449 }
 0x391   :  { %4844 = vrcp.f32 %v450_v28 }
 0x393   :  { %785 = vrot.lane.b32.xlu1 %v5078_v47, %s4944_s5 }
 0x394   :  { %951 = vrot.lane.b32.xlu0 %v5078_v47, %s4945_s6  ;;  %v454_v29 = vpop.permute.xlu0 %453  ;;  %v1161_v47 = vld [vmem:[%s5716_s3 + $0x60] sm:$0xff] }
 0x395   :  { %4524 = vmatpush3.msra.mxu1 %v454_v29  ;;  %v4257_v29 = vld [vmem:[%s5716_s3 + $0x18e] ss:$0 sm:$0xff] }
 0x396   :  { %4533 = vmatprep.subr.mxu1 %v4936_v2 }
 0x39e   :  { %v4845_v30 = vpop.eup %4844 }
 0x39f   :  { %v452_v32 = vmul.f32 %v4845_v30, %v4837_v11 }
 0x3a1   :  { %4526 = vmatmul.mubr.msk.f32.vlgmr.msra.gmra.mxu1 %vm364_vm4, %v452_v32  ;;  %v4258_v32 = vld [vmem:[%s5716_s3 + $0x18f] ss:$0 sm:$0xff] }
 0x3a2   :  { %4534 = vmatpush3.msra.mxu1 %v620_v33  ;;  %4535 = vmatprep.mubr.msk.f32.mxu1 %vm4937_vm1, %v4936_v2 }
 0x3a3   :  { %4543 = vmatprep.subr.mxu1 %v4936_v2 }
 0x403   :  { %v616_v35 = vpop.xlane.xlu1 %615 }
 0x404   :  { %4846 = vrcp.f32 %v616_v35 }
 0x407   :  { %v782_v36 = vpop.xlane.xlu0 %781 }
 0x408   :  { %4848 = vrcp.f32 %v782_v36  ;;  %v1151_v36 = vld [vmem:[%s5716_s3 + $0x191] sm:$0x1] }
 0x40b   :  { %v948_v37 = vpop.xlane.xlu1 %947  ;;  %v952_v44 = vpop.permute.xlu0 %951 }
 0x40c   :  { %4850 = vrcp.f32 %v948_v37 }
 0x40f   :  { %v786_v41 = vpop.permute.xlu1 %785 }
 0x411   :  { %v4847_v38 = vpop.eup %4846 }
 0x412   :  { %v618_v40 = vmul.f32 %v4847_v38, %v4839_v22  ;;  %v4263_v22 = vld [vmem:[%s5715_s2 + $0x30] sm:$0xff] }
 0x414   :  { %4536 = vmatmul.mubr.msk.f32.vlgmr.msra.gmra.mxu1 %vm364_vm4, %v618_v40 }
 0x415   :  { %v4849_v42 = vpop.eup %4848  ;;  %4544 = vmatpush3.msra.mxu1 %v786_v41  ;;  %4545 = vmatprep.mubr.msk.f32.mxu1 %vm4937_vm1, %v4936_v2 }
 0x416   :  { %4553 = vmatprep.subr.mxu1 %v4936_v2  ;;  %v784_v43 = vmul.f32 %v4849_v42, %v4841_v24  ;;  %v4261_v24 = vld [vmem:[%s5715_s2 + $0x20] sm:$0xff] }
 0x418   :  { %4546 = vmatmul.mubr.msk.f32.vlgmr.msra.gmra.mxu1 %vm364_vm4, %v784_v43 }
 0x419   :  { %v4851_v45 = vpop.eup %4850  ;;  %4554 = vmatpush3.msra.mxu1 %v952_v44  ;;  %4555 = vmatprep.mubr.msk.f32.mxu1 %vm4937_vm1, %v4936_v2 }
 0x41a   :  { %4569 = vmatprep.subr.mxu1 %v4936_v2  ;;  %v950_v46 = vmul.f32 %v4851_v45, %v4843_v26 }
 0x41c   :  { %4556 = vmatmul.mubr.msk.f32.vlgmr.msra.gmra.mxu1 %vm364_vm4, %v950_v46 }
 0x41d   :  { %4570 = vmatpush3.msra.mxu1 %v1161_v47  ;;  %4577 = vmatprep.mubr.msk.f32.mxu1 %vm4937_vm1, %v4936_v2 }
 0x41e   :  { %4571 = vmatprep.subr.mxu1 %v4936_v2 }
 0x41f   :  { %4572 = vmatpush3.msra.mxu1 %v1160_v48 }
 0x420   :  { %4573 = vmatprep.subr.mxu1 %v4936_v2 }
 0x421   :  { %4574 = vmatpush3.msra.mxu1 %v1159_v49 }
 0x422   :  { %4575 = vmatprep.subr.mxu1 %v4936_v2 }
 0x423   :  { %4576 = vmatpush3.msra.mxu1 %v1158_v50 }
 0x424   :  { %4578 = vmatmul.mubr.msk.f32.vlgmr.msra.gmra.mxu1 %vm199_vm3, %v5059_v34  ;;  %4591 = vmatprep.subr.mxu1 %v4936_v2 }
 0x425   :  { %4593 = vmatprep.mubr.msk.f32.mxu1 %vm4937_vm1, %v4936_v2 }
 0x461   :  { %v525_v51 = vpop.f32.mrf.mxu1 }
 0x463   :  { %v4527_v52 = vpop.f32.mrf.mxu1 }
 0x4d4   :  { %v691_v57 = vpop.f32.mrf.mxu1 }
 0x4d5   :  { %1028 = vrot.lane.b32.xlu1 %v691_v57, %s4946_s24 }
 0x4d6   :  { %v4537_v58 = vpop.f32.mrf.mxu1 }
 0x4d8   :  { %v857_v59 = vpop.f32.mrf.mxu1 }
 0x4d9   :  { %1032 = vrot.lane.b32.xlu0 %v857_v59, %s4947_s25 }
 0x4da   :  { %v4547_v60 = vpop.f32.mrf.mxu1 }
 0x4dc   :  { %v1023_v61 = vpop.f32.mrf.mxu1 }
 0x4dd   :  { %1036 = vrot.lane.b32.xlu1 %v1023_v61, %s4948_s26 }
 0x4de   :  { %v4557_v62 = vpop.f32.mrf.mxu1 }
 0x4e4   :  { %v1233_v63 = vpop.f32.mrf.mxu1 }
 0x4e5   :  { %v1234_v16 = vadd.f32 %v4259_v15, %v1233_v63 }
 0x4e6   :  { %v4579_v0 = vpop.f32.mrf.mxu1 }
 0x547   :  { %v1029_v1 = vpop.permute.xlu1 %1028 }
 0x548   :  { %v1039_v4 = vsel %vm364_vm4, %v525_v51, %v1029_v1 }
 0x54b   :  { %v1033_v3 = vpop.permute.xlu0 %1032 }
 0x54c   :  { %v1040_v5 = vsel %vm26_vm0, %v1039_v4, %v1033_v3 }
 0x54f   :  { %v1037_v6 = vpop.permute.xlu1 %1036 }
 0x550   :  { %v1041_v7 = vsel %vm114_vm2, %v1040_v5, %v1037_v6 }
 0x551   :  { %4567 = vmatmul.mubr.msk.f32.vlgmr.msra.gmra.mxu0 %vm199_vm3, %v1041_v7 }
 0x552   :  { %4588 = vmatprep.mubr.msk.f32.mxu0 %vm4937_vm1, %v4936_v2  ;;  %4581 = vmatpush3.msra.mxu0 %v4264_v21 }
 0x553   :  { %4582 = vmatprep.subr.mxu0 %v4936_v2 }
 0x554   :  { %4583 = vmatpush3.msra.mxu0 %v4263_v22 }
 0x555   :  { %4584 = vmatprep.subr.mxu0 %v4936_v2 }
 0x556   :  { %4585 = vmatpush3.msra.mxu0 %v4262_v23 }
 0x557   :  { %4586 = vmatprep.subr.mxu0 %v4936_v2 }
 0x558   :  { %4587 = vmatpush3.msra.mxu0 %v4261_v24 }
 0x559   :  { %4601 = vmatprep.subr.mxu0 %v4936_v2 }
 0x611   :  { %v1120_v9 = vpop.f32.mrf.mxu0 }
 0x612   :  { %v1121_v10 = vadd.f32 %v4255_v8, %v1120_v9 }
 0x613   :  { %v4568_v11 = vpop.f32.mrf.mxu0 }
 0x614   :  { %v1124_v12 = vadd.f32 %v1121_v10, %v5055_v31 }
 0x616   :  { %v1127_v13 = vsel %vm199_vm3, %v1124_v12, 0.0 }
 0x617   :  { %1128 = vadd.xlane.f32.xlu0 %v1127_v13 }
 0x62d   :  { %1154 = vrot.lane.b32.xlu0 %v1152_v14, %s4938_s19 }
 0x631   :  { %1483 = vrot.lane.b32.xlu0 %v1234_v16, %s4939_s0 }
 0x635   :  { %1649 = vrot.lane.b32.xlu0 %v1234_v16, %s4940_s1 }
 0x639   :  { %1815 = vrot.lane.b32.xlu0 %v1234_v16, %s4941_s28 }
 0x6a0   :  { %v1129_v31 = vpop.xlane.xlu0 %1128 }
 0x6a1   :  { %v1131_v17 = vmul.f32 0.03125, %v1129_v31 }
 0x6a3   :  { %v1132_v18 = vsub.f32 %v1124_v12, %v1131_v17 }
 0x6a4   :  { %v1155_v37 = vpop.permute.xlu0 %1154 }
 0x6a5   :  { %v1133_v19 = vmul.f32 %v1132_v18, %v1132_v18  ;;  %v1157_v38 = vsel %vm199_vm3, %v1151_v36, %v1155_v37 }
 0x6a6   :  { %v1245_v40 = vrot.slane %v1157_v38, %v5070_v39 }
 0x6a7   :  { %v1134_v20 = vsel %vm199_vm3, %v1133_v19, 0.0 }
 0x6a8   :  { %1135 = vadd.xlane.f32.xlu1 %v1134_v20  ;;  %v1484_v44 = vpop.permute.xlu0 %1483 }
 0x6ac   :  { %v1650_v47 = vpop.permute.xlu0 %1649 }
 0x6b0   :  { %v1816_v49 = vpop.permute.xlu0 %1815 }
 0x731   :  { %v1136_v25 = vpop.xlane.xlu1 %1135 }
 0x732   :  { %v1137_v26 = vmul.f32 0.03125, %v1136_v25 }
 0x734   :  { %v1138_v27 = vadd.f32 1e-05, %v1137_v26 }
 0x736   :  { %4852 = vrsqrt.f32 %v1138_v27 }
 0x743   :  { %v4853_v28 = vpop.eup %4852 }
 0x744   :  { %v1140_v30 = vmul.f32 %v4853_v28, %v1132_v18 }
 0x746   :  { %v1145_v33 = vmul.f32 %v4257_v29, %v1140_v30 }
 0x748   :  { %v5224_v35 = vadd.f32 %v4258_v32, %v1145_v33 }
 0x74a   :  { %4589 = vmatmul.mubr.msk.f32.vlgmr.msra.gmra.mxu0 %vm199_vm3, %v5224_v35 }
 0x74b   :  { %4603 = vmatprep.mubr.msk.f32.mxu0 %vm4937_vm1, %v4936_v2 }
 0x80a   :  { %v1315_v41 = vpop.f32.mrf.mxu0 }
 0x80b   :  { %v5235_v42 = vadd.f32 %v1315_v41, %v1245_v40 }
 0x80c   :  { %v4590_v43 = vpop.f32.mrf.mxu0 }
 0x80d   :  { %1485 = vrot.lane.b32.xlu1 %v5235_v42, %s4939_s0  ;;  %4592 = vmatpush3.xpose.msk.msra.mxu1 %vm364_vm4, %v5235_v42  ;;  %v2113_v43 = vld [vmem:[%s5716_s3 + $0x78] sm:$0xff] }
 0x80e   :  { %4596 = vmatprep.subr.mxu1 %v4936_v2 }
 0x810   :  { %4594 = vmatmul.mubr.msk.f32.vlgmr.msra.gmra.mxu1 %vm364_vm4, %v1234_v16 }
 0x811   :  { %1651 = vrot.lane.b32.xlu1 %v5235_v42, %s4940_s1  ;;  %4598 = vmatprep.mubr.msk.f32.mxu1 %vm4937_vm1, %v4936_v2 }
 0x815   :  { %1817 = vrot.lane.b32.xlu1 %v5235_v42, %s4941_s28 }
 0x87f   :  { %v1486_v45 = vpop.permute.xlu1 %1485 }
 0x880   :  { %4602 = vmatpush3.xpose.msk.msra.mxu0 %vm364_vm4, %v1486_v45  ;;  %v2111_v45 = vld [vmem:[%s5716_s3 + $0x68] sm:$0xff] }
 0x881   :  { %4611 = vmatprep.subr.mxu0 %v4936_v2 }
 0x883   :  { %4604 = vmatmul.mubr.msk.f32.vlgmr.msra.gmra.mxu0 %vm364_vm4, %v1484_v44  ;;  %v1652_v46 = vpop.permute.xlu1 %1651  ;;  %v2112_v44 = vld [vmem:[%s5716_s3 + $0x70] sm:$0xff] }
 0x884   :  { %4612 = vmatpush3.xpose.msk.msra.mxu0 %vm364_vm4, %v1652_v46  ;;  %4613 = vmatprep.mubr.msk.f32.mxu0 %vm4937_vm1, %v4936_v2 }
 0x885   :  { %4621 = vmatprep.subr.mxu0 %v4936_v2 }
 0x887   :  { %4614 = vmatmul.mubr.msk.f32.vlgmr.msra.gmra.mxu0 %vm364_vm4, %v1650_v47  ;;  %v1818_v48 = vpop.permute.xlu1 %1817 }
 0x888   :  { %4622 = vmatpush3.xpose.msk.msra.mxu0 %vm364_vm4, %v1818_v48  ;;  %4623 = vmatprep.mubr.msk.f32.mxu0 %vm4937_vm1, %v4936_v2  ;;  %v1999_v48 = vld [vmem:[%s5716_s3 + $0xe0] sm:$0xff] }
 0x889   :  { %4631 = vmatprep.subr.mxu0 %v4936_v2 }
 0x88b   :  { %4624 = vmatmul.mubr.msk.f32.vlgmr.msra.gmra.mxu0 %vm364_vm4, %v1816_v49  ;;  %v1998_v49 = vld [vmem:[%s5716_s3 + $0xd8] sm:$0xff] }
 0x88c   :  { %4639 = vmatprep.mubr.msk.f32.mxu0 %vm4937_vm1, %v4936_v2  ;;  %4632 = vmatpush3.msra.mxu0 %v1999_v48 }
 0x88d   :  { %4633 = vmatprep.subr.mxu0 %v4936_v2 }
 0x88e   :  { %4634 = vmatpush3.msra.mxu0 %v1998_v49 }
 0x88f   :  { %4635 = vmatprep.subr.mxu0 %v4936_v2 }
 0x8d0   :  { %v1391_v50 = vpop.f32.mrf.mxu1 }
 0x8d1   :  { %v1395_v51 = vmul.f32 0.35355338, %v1391_v50  ;;  %v1997_v50 = vld [vmem:[%s5716_s3 + $0xd0] sm:$0xff] }
 0x8d2   :  { %v4595_v52 = vpop.f32.mrf.mxu1  ;;  %4636 = vmatpush3.msra.mxu0 %v1997_v50 }
 0x8d3   :  { %v1396_v53 = vsel %vm364_vm4, %v1395_v51, -inf  ;;  %4637 = vmatprep.subr.mxu0 %v4936_v2 }
 0x8d4   :  { %1397 = vmax.xlane.f32.xlu1 %v1396_v53 }
 0x943   :  { %v1557_v54 = vpop.f32.mrf.mxu0 }
 0x944   :  { %v1561_v55 = vmul.f32 0.35355338, %v1557_v54 }
 0x945   :  { %v4605_v56 = vpop.f32.mrf.mxu0 }
 0x946   :  { %v1562_v57 = vsel %vm364_vm4, %v1561_v55, -inf }
 0x947   :  { %1563 = vmax.xlane.f32.xlu0 %v1562_v57  ;;  %v1723_v58 = vpop.f32.mrf.mxu0 }
 0x948   :  { %v1727_v59 = vmul.f32 0.35355338, %v1723_v58 }
 0x949   :  { %v4615_v60 = vpop.f32.mrf.mxu0 }
 0x94a   :  { %v1728_v61 = vsel %vm364_vm4, %v1727_v59, -inf }
 0x94b   :  { %1729 = vmax.xlane.f32.xlu0 %v1728_v61  ;;  %v1889_v62 = vpop.f32.mrf.mxu0 }
 0x94c   :  { %v1893_v63 = vmul.f32 0.35355338, %v1889_v62 }
 0x94d   :  { %v4625_v0 = vpop.f32.mrf.mxu0 }
 0x94e   :  { %v1894_v1 = vsel %vm364_vm4, %v1893_v63, -inf }
 0x94f   :  { %1895 = vmax.xlane.f32.xlu1 %v1894_v1 }
 0x95d   :  { %v1398_v3 = vpop.xlane.xlu1 %1397 }
 0x95e   :  { %v1399_v4 = vsub.f32 %v1395_v51, %v1398_v3  ;;  %v1996_v51 = vld [vmem:[%s5716_s3 + $0xc8] sm:$0xff]  ;;  %v4278_v3 = vld [vmem:[%s5716_s3 + $0x193] ss:$0 sm:$0xff] }
 0x95f   :  { %4638 = vmatpush3.msra.mxu0 %v1996_v51 }
 0x960   :  { %v1400_v5 = vmul.f32 1.442695, %v1399_v4  ;;  %1573 = vrot.lane.b32.xlu1 %v5235_v42, %s4942_s29  ;;  %4653 = vmatprep.subr.mxu0 %v4936_v2 }
 0x962   :  { %4854 = vpow2.f32 %v1400_v5 }
 0x96f   :  { %v4855_v6 = vpop.eup %4854 }
 0x970   :  { %v1402_v7 = vsel %vm364_vm4, %v4855_v6, 0.0 }
 0x971   :  { %1403 = vadd.xlane.f32.xlu0 %v1402_v7 }
 0x987   :  { %1407 = vrot.lane.b32.xlu0 %v5235_v42, %s4943_s30 }
 0x9d0   :  { %v1564_v8 = vpop.xlane.xlu0 %1563 }
 0x9d1   :  { %v1565_v9 = vsub.f32 %v1561_v55, %v1564_v8 }
 0x9d3   :  { %v1566_v10 = vmul.f32 1.442695, %v1565_v9  ;;  %v2105_v9 = vld [vmem:[%s5716_s3 + $0x198] sm:$0x1] }
 0x9d4   :  { %v1730_v11 = vpop.xlane.xlu0 %1729 }
 0x9d5   :  { %4856 = vpow2.f32 %v1566_v10  ;;  %v1731_v12 = vsub.f32 %v1727_v59, %v1730_v11  ;;  %v4282_v10 = vld [vmem:[%s5716_s3 + $0x196] ss:$0 sm:$0xff] }
 0x9d7   :  { %v1732_v13 = vmul.f32 1.442695, %v1731_v12 }
 0x9d8   :  { %v1896_v14 = vpop.xlane.xlu1 %1895 }
 0x9d9   :  { %4858 = vpow2.f32 %v1732_v13  ;;  %v1897_v15 = vsub.f32 %v1893_v63, %v1896_v14 }
 0x9db   :  { %v1898_v16 = vmul.f32 1.442695, %v1897_v15 }
 0x9dc   :  { %v1574_v26 = vpop.permute.xlu1 %1573 }
 0x9dd   :  { %4860 = vpow2.f32 %v1898_v16  ;;  %v4287_v16 = vld [vmem:[%s5715_s2 + $0x58] sm:$0xff] }
 0x9e2   :  { %v4857_v31 = vpop.eup %4856 }
 0x9e3   :  { %v1568_v17 = vsel %vm364_vm4, %v4857_v31, 0.0 }
 0x9e4   :  { %1569 = vadd.xlane.f32.xlu1 %v1568_v17  ;;  %v4285_v17 = vld [vmem:[%s5715_s2 + $0x48] sm:$0xff] }
 0x9e6   :  { %v4859_v18 = vpop.eup %4858 }
 0x9e7   :  { %v1734_v19 = vsel %vm364_vm4, %v4859_v18, 0.0 }
 0x9e8   :  { %1735 = vadd.xlane.f32.xlu0 %v1734_v19 }
 0x9ea   :  { %v4861_v20 = vpop.eup %4860 }
 0x9eb   :  { %v1900_v21 = vsel %vm364_vm4, %v4861_v20, 0.0 }
 0x9ec   :  { %1901 = vadd.xlane.f32.xlu1 %v1900_v21 }
 0x9fa   :  { %v1404_v22 = vpop.xlane.xlu0 %1403 }
 0x9fb   :  { %4862 = vrcp.f32 %v1404_v22 }
 0x9fd   :  { %1739 = vrot.lane.b32.xlu1 %v5235_v42, %s4944_s5 }
 0x9fe   :  { %1905 = vrot.lane.b32.xlu0 %v5235_v42, %s4945_s6  ;;  %v1408_v23 = vpop.permute.xlu0 %1407  ;;  %v2114_v42 = vld [vmem:[%s5716_s3 + $0x80] sm:$0xff] }
 0x9ff   :  { %4597 = vmatpush3.msra.mxu1 %v1408_v23  ;;  %v4280_v23 = vld [vmem:[%s5716_s3 + $0x194] ss:$0 sm:$0xff] }
 0xa00   :  { %4606 = vmatprep.subr.mxu1 %v4936_v2 }
 0xa08   :  { %v4863_v24 = vpop.eup %4862 }
 0xa09   :  { %v1406_v25 = vmul.f32 %v4863_v24, %v4855_v6 }
 0xa0b   :  { %4599 = vmatmul.mubr.msk.f32.vlgmr.msra.gmra.mxu1 %vm364_vm4, %v1406_v25  ;;  %v4281_v25 = vld [vmem:[%s5716_s3 + $0x195] ss:$0 sm:$0xff] }
 0xa0c   :  { %4607 = vmatpush3.msra.mxu1 %v1574_v26  ;;  %4608 = vmatprep.mubr.msk.f32.mxu1 %vm4937_vm1, %v4936_v2 }
 0xa0d   :  { %4616 = vmatprep.subr.mxu1 %v4936_v2 }
 0xa6d   :  { %v1570_v27 = vpop.xlane.xlu1 %1569 }
 0xa6e   :  { %4864 = vrcp.f32 %v1570_v27 }
 0xa71   :  { %v1736_v28 = vpop.xlane.xlu0 %1735 }
 0xa72   :  { %4866 = vrcp.f32 %v1736_v28  ;;  %v2104_v28 = vld [vmem:[%s5716_s3 + $0x197] sm:$0x1] }
 0xa75   :  { %v1902_v29 = vpop.xlane.xlu1 %1901  ;;  %v1906_v38 = vpop.permute.xlu0 %1905 }
 0xa76   :  { %4868 = vrcp.f32 %v1902_v29 }
 0xa79   :  { %v1740_v33 = vpop.permute.xlu1 %1739 }
 0xa7b   :  { %v4865_v30 = vpop.eup %4864 }
 0xa7c   :  { %v1572_v32 = vmul.f32 %v4865_v30, %v4857_v31  ;;  %v4286_v31 = vld [vmem:[%s5715_s2 + $0x50] sm:$0xff] }
 0xa7e   :  { %4609 = vmatmul.mubr.msk.f32.vlgmr.msra.gmra.mxu1 %vm364_vm4, %v1572_v32 }
 0xa7f   :  { %v4867_v36 = vpop.eup %4866  ;;  %4617 = vmatpush3.msra.mxu1 %v1740_v33  ;;  %4618 = vmatprep.mubr.msk.f32.mxu1 %vm4937_vm1, %v4936_v2 }
 0xa80   :  { %4626 = vmatprep.subr.mxu1 %v4936_v2  ;;  %v1738_v37 = vmul.f32 %v4867_v36, %v4859_v18  ;;  %v4284_v18 = vld [vmem:[%s5715_s2 + $0x40] sm:$0xff] }
 0xa82   :  { %4619 = vmatmul.mubr.msk.f32.vlgmr.msra.gmra.mxu1 %vm364_vm4, %v1738_v37 }
 0xa83   :  { %v4869_v40 = vpop.eup %4868  ;;  %4627 = vmatpush3.msra.mxu1 %v1906_v38  ;;  %4628 = vmatprep.mubr.msk.f32.mxu1 %vm4937_vm1, %v4936_v2 }
 0xa84   :  { %4642 = vmatprep.subr.mxu1 %v4936_v2  ;;  %v1904_v41 = vmul.f32 %v4869_v40, %v4861_v20 }
 0xa86   :  { %4629 = vmatmul.mubr.msk.f32.vlgmr.msra.gmra.mxu1 %vm364_vm4, %v1904_v41 }
 0xa87   :  { %4643 = vmatpush3.msra.mxu1 %v2114_v42  ;;  %4650 = vmatprep.mubr.msk.f32.mxu1 %vm4937_vm1, %v4936_v2 }
 0xa88   :  { %4644 = vmatprep.subr.mxu1 %v4936_v2 }
 0xa89   :  { %4645 = vmatpush3.msra.mxu1 %v2113_v43 }
 0xa8a   :  { %4646 = vmatprep.subr.mxu1 %v4936_v2 }
 0xa8b   :  { %4647 = vmatpush3.msra.mxu1 %v2112_v44 }
 0xa8c   :  { %4648 = vmatprep.subr.mxu1 %v4936_v2 }
 0xa8d   :  { %4649 = vmatpush3.msra.mxu1 %v2111_v45 }
 0xa8e   :  { %4651 = vmatmul.mubr.msk.f32.vlgmr.msra.gmra.mxu1 %vm199_vm3, %v5224_v35  ;;  %4664 = vmatprep.subr.mxu1 %v4936_v2 }
 0xa8f   :  { %4666 = vmatprep.mubr.msk.f32.mxu1 %vm4937_vm1, %v4936_v2 }
 0xacb   :  { %v1479_v46 = vpop.f32.mrf.mxu1 }
 0xacd   :  { %v4600_v47 = vpop.f32.mrf.mxu1 }
 0xb3e   :  { %v1645_v52 = vpop.f32.mrf.mxu1 }
 0xb3f   :  { %1982 = vrot.lane.b32.xlu1 %v1645_v52, %s4946_s24 }
 0xb40   :  { %v4610_v53 = vpop.f32.mrf.mxu1 }
 0xb42   :  { %v1811_v54 = vpop.f32.mrf.mxu1 }
 0xb43   :  { %1986 = vrot.lane.b32.xlu0 %v1811_v54, %s4947_s25 }
 0xb44   :  { %v4620_v55 = vpop.f32.mrf.mxu1 }
 0xb46   :  { %v1977_v56 = vpop.f32.mrf.mxu1 }
 0xb47   :  { %1990 = vrot.lane.b32.xlu1 %v1977_v56, %s4948_s26 }
 0xb48   :  { %v4630_v57 = vpop.f32.mrf.mxu1 }
 0xb4e   :  { %v2186_v58 = vpop.f32.mrf.mxu1 }
 0xb4f   :  { %v2187_v11 = vadd.f32 %v4282_v10, %v2186_v58 }
 0xb50   :  { %v4652_v59 = vpop.f32.mrf.mxu1 }
 0xbb1   :  { %v1983_v60 = vpop.permute.xlu1 %1982 }
 0xbb2   :  { %v1993_v62 = vsel %vm364_vm4, %v1479_v46, %v1983_v60 }
 0xbb5   :  { %v1987_v61 = vpop.permute.xlu0 %1986 }
 0xbb6   :  { %v1994_v63 = vsel %vm26_vm0, %v1993_v62, %v1987_v61 }
 0xbb9   :  { %v1991_v0 = vpop.permute.xlu1 %1990 }
 0xbba   :  { %v1995_v1 = vsel %vm114_vm2, %v1994_v63, %v1991_v0 }
 0xbbb   :  { %4640 = vmatmul.mubr.msk.f32.vlgmr.msra.gmra.mxu0 %vm199_vm3, %v1995_v1 }
 0xbbc   :  { %4661 = vmatprep.mubr.msk.f32.mxu0 %vm4937_vm1, %v4936_v2  ;;  %4654 = vmatpush3.msra.mxu0 %v4287_v16 }
 0xbbd   :  { %4655 = vmatprep.subr.mxu0 %v4936_v2 }
 0xbbe   :  { %4656 = vmatpush3.msra.mxu0 %v4286_v31 }
 0xbbf   :  { %4657 = vmatprep.subr.mxu0 %v4936_v2 }
 0xbc0   :  { %4658 = vmatpush3.msra.mxu0 %v4285_v17 }
 0xbc1   :  { %4659 = vmatprep.subr.mxu0 %v4936_v2 }
 0xbc2   :  { %4660 = vmatpush3.msra.mxu0 %v4284_v18 }
 0xbc3   :  { %4674 = vmatprep.subr.mxu0 %v4936_v2 }
 0xc7b   :  { %v2074_v4 = vpop.f32.mrf.mxu0 }
 0xc7c   :  { %v2075_v5 = vadd.f32 %v4278_v3, %v2074_v4 }
 0xc7d   :  { %v4641_v6 = vpop.f32.mrf.mxu0 }
 0xc7e   :  { %v2078_v7 = vadd.f32 %v2075_v5, %v5059_v34 }
 0xc80   :  { %v2081_v8 = vsel %vm199_vm3, %v2078_v7, 0.0 }
 0xc81   :  { %2082 = vadd.xlane.f32.xlu0 %v2081_v8 }
 0xc97   :  { %2107 = vrot.lane.b32.xlu0 %v2105_v9, %s4938_s19 }
 0xc9b   :  { %2436 = vrot.lane.b32.xlu0 %v2187_v11, %s4939_s0 }
 0xc9f   :  { %2602 = vrot.lane.b32.xlu0 %v2187_v11, %s4940_s1 }
 0xca3   :  { %2768 = vrot.lane.b32.xlu0 %v2187_v11, %s4941_s28 }
 0xd0a   :  { %v2083_v34 = vpop.xlane.xlu0 %2082 }
 0xd0b   :  { %v2084_v12 = vmul.f32 0.03125, %v2083_v34 }
 0xd0d   :  { %v2085_v13 = vsub.f32 %v2078_v7, %v2084_v12 }
 0xd0e   :  { %v2108_v29 = vpop.permute.xlu0 %2107 }
 0xd0f   :  { %v2086_v14 = vmul.f32 %v2085_v13, %v2085_v13  ;;  %v2110_v30 = vsel %vm199_vm3, %v2104_v28, %v2108_v29 }
 0xd10   :  { %v2198_v32 = vrot.slane %v2110_v30, %v5070_v39 }
 0xd11   :  { %v2087_v15 = vsel %vm199_vm3, %v2086_v14, 0.0 }
 0xd12   :  { %2088 = vadd.xlane.f32.xlu1 %v2087_v15  ;;  %v2437_v38 = vpop.permute.xlu0 %2436 }
 0xd16   :  { %v2603_v42 = vpop.permute.xlu0 %2602 }
 0xd1a   :  { %v2769_v44 = vpop.permute.xlu0 %2768 }
 0xd9b   :  { %v2089_v19 = vpop.xlane.xlu1 %2088 }
 0xd9c   :  { %v2090_v20 = vmul.f32 0.03125, %v2089_v19 }
 0xd9e   :  { %v2091_v21 = vadd.f32 1e-05, %v2090_v20 }
 0xda0   :  { %4870 = vrsqrt.f32 %v2091_v21 }
 0xdad   :  { %v4871_v22 = vpop.eup %4870 }
 0xdae   :  { %v2093_v24 = vmul.f32 %v4871_v22, %v2085_v13 }
 0xdb0   :  { %v2098_v26 = vmul.f32 %v4280_v23, %v2093_v24 }
 0xdb2   :  { %v5379_v27 = vadd.f32 %v4281_v25, %v2098_v26 }
 0xdb4   :  { %4662 = vmatmul.mubr.msk.f32.vlgmr.msra.gmra.mxu0 %vm199_vm3, %v5379_v27 }
 0xdb5   :  { %4676 = vmatprep.mubr.msk.f32.mxu0 %vm4937_vm1, %v4936_v2 }
 0xe74   :  { %v2268_v33 = vpop.f32.mrf.mxu0 }
 0xe75   :  { %v5390_v36 = vadd.f32 %v2268_v33, %v2198_v32 }
 0xe76   :  { %v4663_v37 = vpop.f32.mrf.mxu0 }
 0xe77   :  { %2438 = vrot.lane.b32.xlu1 %v5390_v36, %s4939_s0  ;;  %4665 = vmatpush3.xpose.msk.msra.mxu1 %vm364_vm4, %v5390_v36  ;;  %v3066_v37 = vld [vmem:[%s5716_s3 + $0x98] sm:$0xff] }
 0xe78   :  { %4669 = vmatprep.subr.mxu1 %v4936_v2 }
 0xe7a   :  { %4667 = vmatmul.mubr.msk.f32.vlgmr.msra.gmra.mxu1 %vm364_vm4, %v2187_v11 }
 0xe7b   :  { %2604 = vrot.lane.b32.xlu1 %v5390_v36, %s4940_s1  ;;  %4671 = vmatprep.mubr.msk.f32.mxu1 %vm4937_vm1, %v4936_v2 }
 0xe7f   :  { %2770 = vrot.lane.b32.xlu1 %v5390_v36, %s4941_s28 }
 0xee9   :  { %v2439_v40 = vpop.permute.xlu1 %2438 }
 0xeea   :  { %4675 = vmatpush3.xpose.msk.msra.mxu0 %vm364_vm4, %v2439_v40  ;;  %v3064_v40 = vld [vmem:[%s5716_s3 + $0x88] sm:$0xff] }
 0xeeb   :  { %4684 = vmatprep.subr.mxu0 %v4936_v2 }
 0xeed   :  { %4677 = vmatmul.mubr.msk.f32.vlgmr.msra.gmra.mxu0 %vm364_vm4, %v2437_v38  ;;  %v2605_v41 = vpop.permute.xlu1 %2604  ;;  %v3065_v38 = vld [vmem:[%s5716_s3 + $0x90] sm:$0xff] }
 0xeee   :  { %4685 = vmatpush3.xpose.msk.msra.mxu0 %vm364_vm4, %v2605_v41  ;;  %4686 = vmatprep.mubr.msk.f32.mxu0 %vm4937_vm1, %v4936_v2 }
 0xeef   :  { %4694 = vmatprep.subr.mxu0 %v4936_v2 }
 0xef1   :  { %4687 = vmatmul.mubr.msk.f32.vlgmr.msra.gmra.mxu0 %vm364_vm4, %v2603_v42  ;;  %v2771_v43 = vpop.permute.xlu1 %2770 }
 0xef2   :  { %4695 = vmatpush3.xpose.msk.msra.mxu0 %vm364_vm4, %v2771_v43  ;;  %4696 = vmatprep.mubr.msk.f32.mxu0 %vm4937_vm1, %v4936_v2  ;;  %v2952_v43 = vld [vmem:[%s5716_s3 + $0x100] sm:$0xff] }
 0xef3   :  { %4704 = vmatprep.subr.mxu0 %v4936_v2 }
 0xef5   :  { %4697 = vmatmul.mubr.msk.f32.vlgmr.msra.gmra.mxu0 %vm364_vm4, %v2769_v44  ;;  %v2951_v44 = vld [vmem:[%s5716_s3 + $0xf8] sm:$0xff] }
 0xef6   :  { %4712 = vmatprep.mubr.msk.f32.mxu0 %vm4937_vm1, %v4936_v2  ;;  %4705 = vmatpush3.msra.mxu0 %v2952_v43 }
 0xef7   :  { %4706 = vmatprep.subr.mxu0 %v4936_v2 }
 0xef8   :  { %4707 = vmatpush3.msra.mxu0 %v2951_v44 }
 0xef9   :  { %4708 = vmatprep.subr.mxu0 %v4936_v2 }
 0xf3a   :  { %v2344_v45 = vpop.f32.mrf.mxu1 }
 0xf3b   :  { %v2348_v46 = vmul.f32 0.35355338, %v2344_v45  ;;  %v2950_v45 = vld [vmem:[%s5716_s3 + $0xf0] sm:$0xff] }
 0xf3c   :  { %v4668_v47 = vpop.f32.mrf.mxu1  ;;  %4709 = vmatpush3.msra.mxu0 %v2950_v45 }
 0xf3d   :  { %v2349_v48 = vsel %vm364_vm4, %v2348_v46, -inf  ;;  %4710 = vmatprep.subr.mxu0 %v4936_v2 }
 0xf3e   :  { %2350 = vmax.xlane.f32.xlu1 %v2349_v48 }
 0xfad   :  { %v2510_v49 = vpop.f32.mrf.mxu0 }
 0xfae   :  { %v2514_v50 = vmul.f32 0.35355338, %v2510_v49 }
 0xfaf   :  { %v4678_v51 = vpop.f32.mrf.mxu0 }
 0xfb0   :  { %v2515_v52 = vsel %vm364_vm4, %v2514_v50, -inf }
 0xfb1   :  { %2516 = vmax.xlane.f32.xlu0 %v2515_v52  ;;  %v2676_v53 = vpop.f32.mrf.mxu0 }
 0xfb2   :  { %v2680_v54 = vmul.f32 0.35355338, %v2676_v53 }
 0xfb3   :  { %v4688_v55 = vpop.f32.mrf.mxu0 }
 0xfb4   :  { %v2681_v56 = vsel %vm364_vm4, %v2680_v54, -inf }
 0xfb5   :  { %2682 = vmax.xlane.f32.xlu0 %v2681_v56  ;;  %v2842_v57 = vpop.f32.mrf.mxu0 }
 0xfb6   :  { %v2846_v58 = vmul.f32 0.35355338, %v2842_v57 }
 0xfb7   :  { %v4698_v59 = vpop.f32.mrf.mxu0 }
 0xfb8   :  { %v2847_v60 = vsel %vm364_vm4, %v2846_v58, -inf }
 0xfb9   :  { %2848 = vmax.xlane.f32.xlu1 %v2847_v60 }
 0xfc7   :  { %v2351_v61 = vpop.xlane.xlu1 %2350 }
 0xfc8   :  { %v2352_v62 = vsub.f32 %v2348_v46, %v2351_v61  ;;  %v2949_v46 = vld [vmem:[%s5716_s3 + $0xe8] sm:$0xff]  ;;  %v4301_v61 = vld [vmem:[%s5716_s3 + $0x199] ss:$0 sm:$0xff] }
 0xfc9   :  { %4711 = vmatpush3.msra.mxu0 %v2949_v46 }
 0xfca   :  { %v2353_v63 = vmul.f32 1.442695, %v2352_v62  ;;  %2526 = vrot.lane.b32.xlu1 %v5390_v36, %s4942_s29  ;;  %4726 = vmatprep.subr.mxu0 %v4936_v2 }
 0xfcc   :  { %4872 = vpow2.f32 %v2353_v63 }
 0xfd9   :  { %v4873_v0 = vpop.eup %4872 }
 0xfda   :  { %v2355_v1 = vsel %vm364_vm4, %v4873_v0, 0.0 }
 0xfdb   :  { %2356 = vadd.xlane.f32.xlu0 %v2355_v1 }
 0xff1   :  { %2360 = vrot.lane.b32.xlu0 %v5390_v36, %s4943_s30 }
0x103a   :  { %v2517_v3 = vpop.xlane.xlu0 %2516 }
0x103b   :  { %v2518_v4 = vsub.f32 %v2514_v50, %v2517_v3 }
0x103d   :  { %v2519_v5 = vmul.f32 1.442695, %v2518_v4  ;;  %v3058_v4 = vld [vmem:[%s5716_s3 + $0x19e] sm:$0x1] }
0x103e   :  { %v2683_v6 = vpop.xlane.xlu0 %2682 }
0x103f   :  { %4874 = vpow2.f32 %v2519_v5  ;;  %v2684_v7 = vsub.f32 %v2680_v54, %v2683_v6  ;;  %v4305_v5 = vld [vmem:[%s5716_s3 + $0x19c] ss:$0 sm:$0xff] }
0x1041   :  { %v2685_v8 = vmul.f32 1.442695, %v2684_v7 }
0x1042   :  { %v2849_v9 = vpop.xlane.xlu1 %2848 }
0x1043   :  { %4876 = vpow2.f32 %v2685_v8  ;;  %v2850_v10 = vsub.f32 %v2846_v58, %v2849_v9 }
0x1045   :  { %v2851_v11 = vmul.f32 1.442695, %v2850_v10 }
0x1046   :  { %v2527_v20 = vpop.permute.xlu1 %2526 }
0x1047   :  { %4878 = vpow2.f32 %v2851_v11  ;;  %v4310_v11 = vld [vmem:[%s5715_s2 + $0x78] sm:$0xff] }
0x104c   :  { %v4875_v34 = vpop.eup %4874 }
0x104d   :  { %v2521_v12 = vsel %vm364_vm4, %v4875_v34, 0.0 }
0x104e   :  { %2522 = vadd.xlane.f32.xlu1 %v2521_v12  ;;  %v4308_v12 = vld [vmem:[%s5715_s2 + $0x68] sm:$0xff] }
0x1050   :  { %v4877_v13 = vpop.eup %4876 }
0x1051   :  { %v2687_v14 = vsel %vm364_vm4, %v4877_v13, 0.0 }
0x1052   :  { %2688 = vadd.xlane.f32.xlu0 %v2687_v14 }
0x1054   :  { %v4879_v15 = vpop.eup %4878 }
0x1055   :  { %v2853_v16 = vsel %vm364_vm4, %v4879_v15, 0.0 }
0x1056   :  { %2854 = vadd.xlane.f32.xlu1 %v2853_v16 }
0x1064   :  { %v2357_v31 = vpop.xlane.xlu0 %2356 }
0x1065   :  { %4880 = vrcp.f32 %v2357_v31 }
0x1067   :  { %2692 = vrot.lane.b32.xlu1 %v5390_v36, %s4944_s5 }
0x1068   :  { %2858 = vrot.lane.b32.xlu0 %v5390_v36, %s4945_s6  ;;  %v2361_v17 = vpop.permute.xlu0 %2360  ;;  %v3067_v36 = vld [vmem:[%s5716_s3 + $0xa0] sm:$0xff] }
0x1069   :  { %4670 = vmatpush3.msra.mxu1 %v2361_v17  ;;  %v4303_v17 = vld [vmem:[%s5716_s3 + $0x19a] ss:$0 sm:$0xff] }
0x106a   :  { %4679 = vmatprep.subr.mxu1 %v4936_v2 }
0x1072   :  { %v4881_v18 = vpop.eup %4880 }
0x1073   :  { %v2359_v19 = vmul.f32 %v4881_v18, %v4873_v0 }
0x1075   :  { %4672 = vmatmul.mubr.msk.f32.vlgmr.msra.gmra.mxu1 %vm364_vm4, %v2359_v19  ;;  %v4304_v19 = vld [vmem:[%s5716_s3 + $0x19b] ss:$0 sm:$0xff] }
0x1076   :  { %4680 = vmatpush3.msra.mxu1 %v2527_v20  ;;  %4681 = vmatprep.mubr.msk.f32.mxu1 %vm4937_vm1, %v4936_v2 }
0x1077   :  { %4689 = vmatprep.subr.mxu1 %v4936_v2 }
0x10d7   :  { %v2523_v21 = vpop.xlane.xlu1 %2522 }
0x10d8   :  { %4882 = vrcp.f32 %v2523_v21 }
0x10db   :  { %v2689_v22 = vpop.xlane.xlu0 %2688 }
0x10dc   :  { %4884 = vrcp.f32 %v2689_v22  ;;  %v3057_v22 = vld [vmem:[%s5716_s3 + $0x19d] sm:$0x1] }
0x10df   :  { %v2855_v23 = vpop.xlane.xlu1 %2854  ;;  %v2859_v30 = vpop.permute.xlu0 %2858 }
0x10e0   :  { %4886 = vrcp.f32 %v2855_v23 }
0x10e3   :  { %v2693_v26 = vpop.permute.xlu1 %2692 }
0x10e5   :  { %v4883_v24 = vpop.eup %4882 }
0x10e6   :  { %v2525_v25 = vmul.f32 %v4883_v24, %v4875_v34  ;;  %v4309_v34 = vld [vmem:[%s5715_s2 + $0x70] sm:$0xff] }
0x10e8   :  { %4682 = vmatmul.mubr.msk.f32.vlgmr.msra.gmra.mxu1 %vm364_vm4, %v2525_v25 }
0x10e9   :  { %v4885_v28 = vpop.eup %4884  ;;  %4690 = vmatpush3.msra.mxu1 %v2693_v26  ;;  %4691 = vmatprep.mubr.msk.f32.mxu1 %vm4937_vm1, %v4936_v2 }
0x10ea   :  { %4699 = vmatprep.subr.mxu1 %v4936_v2  ;;  %v2691_v29 = vmul.f32 %v4885_v28, %v4877_v13  ;;  %v4307_v13 = vld [vmem:[%s5715_s2 + $0x60] sm:$0xff] }
0x10ec   :  { %4692 = vmatmul.mubr.msk.f32.vlgmr.msra.gmra.mxu1 %vm364_vm4, %v2691_v29 }
0x10ed   :  { %v4887_v32 = vpop.eup %4886  ;;  %4700 = vmatpush3.msra.mxu1 %v2859_v30  ;;  %4701 = vmatprep.mubr.msk.f32.mxu1 %vm4937_vm1, %v4936_v2 }
0x10ee   :  { %4715 = vmatprep.subr.mxu1 %v4936_v2  ;;  %v2857_v33 = vmul.f32 %v4887_v32, %v4879_v15 }
0x10f0   :  { %4702 = vmatmul.mubr.msk.f32.vlgmr.msra.gmra.mxu1 %vm364_vm4, %v2857_v33 }
0x10f1   :  { %4716 = vmatpush3.msra.mxu1 %v3067_v36  ;;  %4723 = vmatprep.mubr.msk.f32.mxu1 %vm4937_vm1, %v4936_v2 }
0x10f2   :  { %4717 = vmatprep.subr.mxu1 %v4936_v2 }
0x10f3   :  { %4718 = vmatpush3.msra.mxu1 %v3066_v37 }
0x10f4   :  { %4719 = vmatprep.subr.mxu1 %v4936_v2 }
0x10f5   :  { %4720 = vmatpush3.msra.mxu1 %v3065_v38 }
0x10f6   :  { %4721 = vmatprep.subr.mxu1 %v4936_v2 }
0x10f7   :  { %4722 = vmatpush3.msra.mxu1 %v3064_v40 }
0x10f8   :  { %4724 = vmatmul.mubr.msk.f32.vlgmr.msra.gmra.mxu1 %vm199_vm3, %v5379_v27  ;;  %4737 = vmatprep.subr.mxu1 %v4936_v2 }
0x10f9   :  { %4739 = vmatprep.mubr.msk.f32.mxu1 %vm4937_vm1, %v4936_v2 }
0x1135   :  { %v2432_v41 = vpop.f32.mrf.mxu1 }
0x1137   :  { %v4673_v42 = vpop.f32.mrf.mxu1 }
0x11a8   :  { %v2598_v47 = vpop.f32.mrf.mxu1 }
0x11a9   :  { %2935 = vrot.lane.b32.xlu1 %v2598_v47, %s4946_s24 }
0x11aa   :  { %v4683_v48 = vpop.f32.mrf.mxu1 }
0x11ac   :  { %v2764_v49 = vpop.f32.mrf.mxu1 }
0x11ad   :  { %2939 = vrot.lane.b32.xlu0 %v2764_v49, %s4947_s25 }
0x11ae   :  { %v4693_v50 = vpop.f32.mrf.mxu1 }
0x11b0   :  { %v2930_v51 = vpop.f32.mrf.mxu1 }
0x11b1   :  { %2943 = vrot.lane.b32.xlu1 %v2930_v51, %s4948_s26 }
0x11b2   :  { %v4703_v52 = vpop.f32.mrf.mxu1 }
0x11b8   :  { %v3139_v53 = vpop.f32.mrf.mxu1 }
0x11b9   :  { %v3140_v6 = vadd.f32 %v4305_v5, %v3139_v53 }
0x11ba   :  { %v4725_v54 = vpop.f32.mrf.mxu1 }
0x121b   :  { %v2936_v55 = vpop.permute.xlu1 %2935 }
0x121c   :  { %v2946_v57 = vsel %vm364_vm4, %v2432_v41, %v2936_v55 }
0x121f   :  { %v2940_v56 = vpop.permute.xlu0 %2939 }
0x1220   :  { %v2947_v58 = vsel %vm26_vm0, %v2946_v57, %v2940_v56 }
0x1223   :  { %v2944_v59 = vpop.permute.xlu1 %2943 }
0x1224   :  { %v2948_v60 = vsel %vm114_vm2, %v2947_v58, %v2944_v59 }
0x1225   :  { %4713 = vmatmul.mubr.msk.f32.vlgmr.msra.gmra.mxu0 %vm199_vm3, %v2948_v60 }
0x1226   :  { %4734 = vmatprep.mubr.msk.f32.mxu0 %vm4937_vm1, %v4936_v2  ;;  %4727 = vmatpush3.msra.mxu0 %v4310_v11 }
0x1227   :  { %4728 = vmatprep.subr.mxu0 %v4936_v2 }
0x1228   :  { %4729 = vmatpush3.msra.mxu0 %v4309_v34 }
0x1229   :  { %4730 = vmatprep.subr.mxu0 %v4936_v2 }
0x122a   :  { %4731 = vmatpush3.msra.mxu0 %v4308_v12 }
0x122b   :  { %4732 = vmatprep.subr.mxu0 %v4936_v2 }
0x122c   :  { %4733 = vmatpush3.msra.mxu0 %v4307_v13 }
0x122d   :  { %4747 = vmatprep.subr.mxu0 %v4936_v2 }
0x12e5   :  { %v3027_v62 = vpop.f32.mrf.mxu0 }
0x12e6   :  { %v3028_v63 = vadd.f32 %v4301_v61, %v3027_v62 }
0x12e7   :  { %v4714_v0 = vpop.f32.mrf.mxu0 }
0x12e8   :  { %v3031_v1 = vadd.f32 %v3028_v63, %v5224_v35 }
0x12ea   :  { %v3034_v3 = vsel %vm199_vm3, %v3031_v1, 0.0 }
0x12eb   :  { %3035 = vadd.xlane.f32.xlu0 %v3034_v3 }
0x1301   :  { %3060 = vrot.lane.b32.xlu0 %v3058_v4, %s4938_s19 }
0x1305   :  { %3389 = vrot.lane.b32.xlu0 %v3140_v6, %s4939_s0 }
0x1309   :  { %3555 = vrot.lane.b32.xlu0 %v3140_v6, %s4940_s1 }
0x130d   :  { %3721 = vrot.lane.b32.xlu0 %v3140_v6, %s4941_s28 }
0x1374   :  { %v3036_v35 = vpop.xlane.xlu0 %3035 }
0x1375   :  { %v3037_v7 = vmul.f32 0.03125, %v3036_v35 }
0x1377   :  { %v3038_v8 = vsub.f32 %v3031_v1, %v3037_v7 }
0x1378   :  { %v3061_v23 = vpop.permute.xlu0 %3060 }
0x1379   :  { %v3039_v9 = vmul.f32 %v3038_v8, %v3038_v8  ;;  %v3063_v24 = vsel %vm199_vm3, %v3057_v22, %v3061_v23 }
0x137a   :  { %v3151_v25 = vrot.slane %v3063_v24, %v5070_v39 }
0x137b   :  { %v3040_v10 = vsel %vm199_vm3, %v3039_v9, 0.0 }
0x137c   :  { %3041 = vadd.xlane.f32.xlu1 %v3040_v10  ;;  %v3390_v39 = vpop.permute.xlu0 %3389 }
0x1380   :  { %v3556_v33 = vpop.permute.xlu0 %3555 }
0x1384   :  { %v3722_v37 = vpop.permute.xlu0 %3721 }
0x1405   :  { %v3042_v14 = vpop.xlane.xlu1 %3041 }
0x1406   :  { %v3043_v15 = vmul.f32 0.03125, %v3042_v14 }
0x1408   :  { %v3044_v16 = vadd.f32 1e-05, %v3043_v15 }
0x140a   :  { %4888 = vrsqrt.f32 %v3044_v16 }
0x1417   :  { %v4889_v31 = vpop.eup %4888 }
0x1418   :  { %v3046_v18 = vmul.f32 %v4889_v31, %v3038_v8 }
0x141a   :  { %v3051_v20 = vmul.f32 %v4303_v17, %v3046_v18 }
0x141c   :  { %v5534_v21 = vadd.f32 %v4304_v19, %v3051_v20 }
0x141e   :  { %4735 = vmatmul.mubr.msk.f32.vlgmr.msra.gmra.mxu0 %vm199_vm3, %v5534_v21 }
0x141f   :  { %4749 = vmatprep.mubr.msk.f32.mxu0 %vm4937_vm1, %v4936_v2 }
0x14de   :  { %v3221_v26 = vpop.f32.mrf.mxu0 }
0x14df   :  { %v5545_v28 = vadd.f32 %v3221_v26, %v3151_v25 }
0x14e0   :  { %v4736_v29 = vpop.f32.mrf.mxu0 }
0x14e1   :  { %3391 = vrot.lane.b32.xlu1 %v5545_v28, %s4939_s0  ;;  %4738 = vmatpush3.xpose.msk.msra.mxu1 %vm364_vm4, %v5545_v28  ;;  %v3905_v29 = vld [vmem:[%s5716_s3 + $0x120] sm:$0xff] }
0x14e2   :  { %4742 = vmatprep.subr.mxu1 %v4936_v2 }
0x14e4   :  { %4740 = vmatmul.mubr.msk.f32.vlgmr.msra.gmra.mxu1 %vm364_vm4, %v3140_v6 }
0x14e5   :  { %3557 = vrot.lane.b32.xlu1 %v5545_v28, %s4940_s1  ;;  %4744 = vmatprep.mubr.msk.f32.mxu1 %vm4937_vm1, %v4936_v2 }
0x14e9   :  { %3723 = vrot.lane.b32.xlu1 %v5545_v28, %s4941_s28 }
0x1553   :  { %v3392_v30 = vpop.permute.xlu1 %3391 }
0x1554   :  { %4748 = vmatpush3.xpose.msk.msra.mxu0 %vm364_vm4, %v3392_v30  ;;  %v3903_v30 = vld [vmem:[%s5716_s3 + $0x110] sm:$0xff] }
0x1555   :  { %4757 = vmatprep.subr.mxu0 %v4936_v2 }
0x1557   :  { %4750 = vmatmul.mubr.msk.f32.vlgmr.msra.gmra.mxu0 %vm364_vm4, %v3390_v39  ;;  %v3558_v32 = vpop.permute.xlu1 %3557  ;;  %v3904_v39 = vld [vmem:[%s5716_s3 + $0x118] sm:$0xff] }
0x1558   :  { %4758 = vmatpush3.xpose.msk.msra.mxu0 %vm364_vm4, %v3558_v32  ;;  %4759 = vmatprep.mubr.msk.f32.mxu0 %vm4937_vm1, %v4936_v2  ;;  %v3902_v32 = vld [vmem:[%s5716_s3 + $0x108] sm:$0xff] }
0x1559   :  { %4767 = vmatprep.subr.mxu0 %v4936_v2 }
0x155b   :  { %4760 = vmatmul.mubr.msk.f32.vlgmr.msra.gmra.mxu0 %vm364_vm4, %v3556_v33  ;;  %v3724_v36 = vpop.permute.xlu1 %3723 }
0x155c   :  { %4768 = vmatpush3.xpose.msk.msra.mxu0 %vm364_vm4, %v3724_v36  ;;  %4769 = vmatprep.mubr.msk.f32.mxu0 %vm4937_vm1, %v4936_v2 }
0x155d   :  { %4777 = vmatprep.subr.mxu0 %v4936_v2 }
0x155f   :  { %4770 = vmatmul.mubr.msk.f32.vlgmr.msra.gmra.mxu0 %vm364_vm4, %v3722_v37 }
0x1560   :  { %4785 = vmatprep.mubr.msk.f32.mxu0 %vm4937_vm1, %v4936_v2  ;;  %4778 = vmatpush3.msra.mxu0 %v3905_v29 }
0x1561   :  { %4779 = vmatprep.subr.mxu0 %v4936_v2 }
0x1562   :  { %4780 = vmatpush3.msra.mxu0 %v3904_v39 }
0x1563   :  { %4781 = vmatprep.subr.mxu0 %v4936_v2 }
0x1564   :  { %4782 = vmatpush3.msra.mxu0 %v3903_v30 }
0x1565   :  { %4783 = vmatprep.subr.mxu0 %v4936_v2 }
0x1566   :  { %4784 = vmatpush3.msra.mxu0 %v3902_v32 }
0x1567   :  { %4807 = vmatprep.subr.mxu0 %v4936_v2 }
0x15a4   :  { %v3297_v38 = vpop.f32.mrf.mxu1 }
0x15a5   :  { %v3301_v40 = vmul.f32 0.35355338, %v3297_v38 }
0x15a6   :  { %v4741_v41 = vpop.f32.mrf.mxu1 }
0x15a7   :  { %v3302_v42 = vsel %vm364_vm4, %v3301_v40, -inf }
0x15a8   :  { %3303 = vmax.xlane.f32.xlu1 %v3302_v42 }
0x1617   :  { %v3463_v43 = vpop.f32.mrf.mxu0 }
0x1618   :  { %v3467_v44 = vmul.f32 0.35355338, %v3463_v43 }
0x1619   :  { %v4751_v45 = vpop.f32.mrf.mxu0 }
0x161a   :  { %v3468_v46 = vsel %vm364_vm4, %v3467_v44, -inf }
0x161b   :  { %3469 = vmax.xlane.f32.xlu0 %v3468_v46  ;;  %v3629_v47 = vpop.f32.mrf.mxu0 }
0x161c   :  { %v3633_v48 = vmul.f32 0.35355338, %v3629_v47 }
0x161d   :  { %v4761_v49 = vpop.f32.mrf.mxu0 }
0x161e   :  { %v3634_v50 = vsel %vm364_vm4, %v3633_v48, -inf }
0x161f   :  { %3635 = vmax.xlane.f32.xlu0 %v3634_v50  ;;  %v3795_v51 = vpop.f32.mrf.mxu0 }
0x1620   :  { %v3799_v52 = vmul.f32 0.35355338, %v3795_v51 }
0x1621   :  { %v4771_v53 = vpop.f32.mrf.mxu0 }
0x1622   :  { %v3800_v54 = vsel %vm364_vm4, %v3799_v52, -inf }
0x1623   :  { %3801 = vmax.xlane.f32.xlu1 %v3800_v54 }
0x1631   :  { %v3304_v55 = vpop.xlane.xlu1 %3303 }
0x1632   :  { %v3305_v56 = vsub.f32 %v3301_v40, %v3304_v55 }
0x1634   :  { %v3306_v57 = vmul.f32 1.442695, %v3305_v56  ;;  %3479 = vrot.lane.b32.xlu1 %v5545_v28, %s4942_s29 }
0x1636   :  { %4890 = vpow2.f32 %v3306_v57 }
0x1643   :  { %v4891_v58 = vpop.eup %4890 }
0x1644   :  { %v3308_v59 = vsel %vm364_vm4, %v4891_v58, 0.0 }
0x1645   :  { %3309 = vadd.xlane.f32.xlu0 %v3308_v59  ;;  %v4022_v59 = vld [vmem:[%s5716_s3 + $0x160] sm:$0xff] }
0x165b   :  { %3313 = vrot.lane.b32.xlu0 %v5545_v28, %s4943_s30 }
0x16a4   :  { %v3470_v60 = vpop.xlane.xlu0 %3469 }
0x16a5   :  { %v3471_v61 = vsub.f32 %v3467_v44, %v3470_v60  ;;  %v4021_v60 = vld [vmem:[%s5716_s3 + $0x158] sm:$0xff] }
0x16a7   :  { %v3472_v62 = vmul.f32 1.442695, %v3471_v61  ;;  %v4019_v61 = vld [vmem:[%s5716_s3 + $0x148] sm:$0xff] }
0x16a8   :  { %v3636_v63 = vpop.xlane.xlu0 %3635 }
0x16a9   :  { %4892 = vpow2.f32 %v3472_v62  ;;  %v3637_v0 = vsub.f32 %v3633_v48, %v3636_v63  ;;  %v4324_v48 = vld [vmem:[%s5716_s3 + $0x19f] ss:$0 sm:$0xff]  ;;  %v4018_v62 = vld [vmem:[%s5716_s3 + $0x140] sm:$0xff] }
0x16aa   :  { %v4017_v63 = vld [vmem:[%s5716_s3 + $0x138] sm:$0xff] }
0x16ab   :  { %v3638_v1 = vmul.f32 1.442695, %v3637_v0  ;;  %v4016_v0 = vld [vmem:[%s5716_s3 + $0x130] sm:$0xff] }
0x16ac   :  { %v3802_v3 = vpop.xlane.xlu1 %3801 }
0x16ad   :  { %4894 = vpow2.f32 %v3638_v1  ;;  %v3803_v4 = vsub.f32 %v3799_v52, %v3802_v3 }
0x16af   :  { %v3804_v5 = vmul.f32 1.442695, %v3803_v4 }
0x16b0   :  { %v3480_v14 = vpop.permute.xlu1 %3479 }
0x16b1   :  { %4896 = vpow2.f32 %v3804_v5  ;;  %v4015_v5 = vld [vmem:[%s5716_s3 + $0x128] sm:$0xff] }
0x16b6   :  { %v4893_v6 = vpop.eup %4892 }
0x16b7   :  { %v3474_v35 = vsel %vm364_vm4, %v4893_v6, 0.0 }
0x16b8   :  { %3475 = vadd.xlane.f32.xlu1 %v3474_v35  ;;  %v4326_v35 = vld [vmem:[%s5716_s3 + $0x1a0] ss:$0 sm:$0xff] }
0x16ba   :  { %v4895_v7 = vpop.eup %4894 }
0x16bb   :  { %v3640_v8 = vsel %vm364_vm4, %v4895_v7, 0.0 }
0x16bc   :  { %3641 = vadd.xlane.f32.xlu0 %v3640_v8  ;;  %v4327_v8 = vld [vmem:[%s5716_s3 + $0x1a1] ss:$0 sm:$0xff] }
0x16be   :  { %v4897_v9 = vpop.eup %4896 }
0x16bf   :  { %v3806_v10 = vsel %vm364_vm4, %v4897_v9, 0.0 }
0x16c0   :  { %3807 = vadd.xlane.f32.xlu1 %v3806_v10 }
0x16ce   :  { %v3310_v11 = vpop.xlane.xlu0 %3309 }
0x16cf   :  { %4898 = vrcp.f32 %v3310_v11 }
0x16d1   :  { %3645 = vrot.lane.b32.xlu1 %v5545_v28, %s4944_s5 }
0x16d2   :  { %3811 = vrot.lane.b32.xlu0 %v5545_v28, %s4945_s6  ;;  %v3314_v34 = vpop.permute.xlu0 %3313 }
0x16d3   :  { %4743 = vmatpush3.msra.mxu1 %v3314_v34 }
0x16d4   :  { %4752 = vmatprep.subr.mxu1 %v4936_v2 }
0x16dc   :  { %v4899_v12 = vpop.eup %4898 }
0x16dd   :  { %v3312_v13 = vmul.f32 %v4899_v12, %v4891_v58  ;;  %v4115_v12 = vld [vmem:[%s5716_s3 + $0x180] sm:$0xff] }
0x16df   :  { %4745 = vmatmul.mubr.msk.f32.vlgmr.msra.gmra.mxu1 %vm364_vm4, %v3312_v13  ;;  %v4114_v13 = vld [vmem:[%s5716_s3 + $0x178] sm:$0xff] }
0x16e0   :  { %4753 = vmatpush3.msra.mxu1 %v3480_v14  ;;  %4754 = vmatprep.mubr.msk.f32.mxu1 %vm4937_vm1, %v4936_v2  ;;  %v4113_v14 = vld [vmem:[%s5716_s3 + $0x170] sm:$0xff] }
0x16e1   :  { %4762 = vmatprep.subr.mxu1 %v4936_v2 }
0x1741   :  { %v3476_v15 = vpop.xlane.xlu1 %3475 }
0x1742   :  { %4900 = vrcp.f32 %v3476_v15  ;;  %v4112_v15 = vld [vmem:[%s5716_s3 + $0x168] sm:$0xff] }
0x1745   :  { %v3642_v16 = vpop.xlane.xlu0 %3641 }
0x1746   :  { %4902 = vrcp.f32 %v3642_v16  ;;  %v4328_v16 = vld [vmem:[%s5716_s3 + $0x1a2] ss:$0 sm:$0xff] }
0x1749   :  { %v3808_v31 = vpop.xlane.xlu1 %3807  ;;  %v3812_v23 = vpop.permute.xlu0 %3811 }
0x174a   :  { %4904 = vrcp.f32 %v3808_v31 }
0x174d   :  { %v3646_v19 = vpop.permute.xlu1 %3645 }
0x174f   :  { %v4901_v17 = vpop.eup %4900 }
0x1750   :  { %v3478_v18 = vmul.f32 %v4901_v17, %v4893_v6 }
0x1752   :  { %4755 = vmatmul.mubr.msk.f32.vlgmr.msra.gmra.mxu1 %vm364_vm4, %v3478_v18 }
0x1753   :  { %v4903_v20 = vpop.eup %4902  ;;  %4763 = vmatpush3.msra.mxu1 %v3646_v19  ;;  %4764 = vmatprep.mubr.msk.f32.mxu1 %vm4937_vm1, %v4936_v2 }
0x1754   :  { %4772 = vmatprep.subr.mxu1 %v4936_v2  ;;  %v3644_v22 = vmul.f32 %v4903_v20, %v4895_v7 }
0x1756   :  { %4765 = vmatmul.mubr.msk.f32.vlgmr.msra.gmra.mxu1 %vm364_vm4, %v3644_v22 }
0x1757   :  { %v4905_v24 = vpop.eup %4904  ;;  %4773 = vmatpush3.msra.mxu1 %v3812_v23  ;;  %4774 = vmatprep.mubr.msk.f32.mxu1 %vm4937_vm1, %v4936_v2 }
0x1758   :  { %v3810_v25 = vmul.f32 %v4905_v24, %v4897_v9  ;;  %4788 = vmatprep.subr.mxu1 %v4936_v2 }
0x175a   :  { %4775 = vmatmul.mubr.msk.f32.vlgmr.msra.gmra.mxu1 %vm364_vm4, %v3810_v25 }
0x175b   :  { %4804 = vmatprep.mubr.msk.f32.mxu1 %vm4937_vm1, %v4936_v2  ;;  %4789 = vmatpush3.msra.mxu1 %v4022_v59 }
0x175c   :  { %4790 = vmatprep.subr.mxu1 %v4936_v2 }
0x175d   :  { %4791 = vmatpush3.msra.mxu1 %v4021_v60 }
0x175e   :  { %4792 = vmatprep.subr.mxu1 %v4936_v2 }
0x179f   :  { %v3385_v26 = vpop.f32.mrf.mxu1 }
0x17a1   :  { %v4746_v28 = vpop.f32.mrf.mxu1 }
0x1812   :  { %v3551_v33 = vpop.f32.mrf.mxu1 }
0x1813   :  { %3888 = vrot.lane.b32.xlu1 %v3551_v33, %s4946_s24 }
0x1814   :  { %v4756_v36 = vpop.f32.mrf.mxu1 }
0x1816   :  { %v3717_v37 = vpop.f32.mrf.mxu1 }
0x1817   :  { %3892 = vrot.lane.b32.xlu0 %v3717_v37, %s4947_s25 }
0x1818   :  { %v4766_v38 = vpop.f32.mrf.mxu1 }
0x181a   :  { %v3883_v40 = vpop.f32.mrf.mxu1 }
0x181b   :  { %3896 = vrot.lane.b32.xlu1 %v3883_v40, %s4948_s26 }
0x181c   :  { %v4776_v41 = vpop.f32.mrf.mxu1 }
0x1885   :  { %v3889_v42 = vpop.permute.xlu1 %3888 }
0x1886   :  { %v3899_v44 = vsel %vm364_vm4, %v3385_v26, %v3889_v42 }
0x1889   :  { %v3893_v43 = vpop.permute.xlu0 %3892 }
0x188a   :  { %v3900_v45 = vsel %vm26_vm0, %v3899_v44, %v3893_v43 }
0x188d   :  { %v3897_v46 = vpop.permute.xlu1 %3896 }
0x188e   :  { %v3901_v47 = vsel %vm114_vm2, %v3900_v45, %v3897_v46 }
0x188f   :  { %4786 = vmatmul.mubr.msk.f32.vlgmr.msra.gmra.mxu0 %vm199_vm3, %v3901_v47 }
0x1890   :  { %4815 = vmatprep.mubr.msk.f32.mxu0 %vm4937_vm1, %v4936_v2  ;;  %4808 = vmatpush3.msra.mxu0 %v4115_v12 }
0x1891   :  { %4809 = vmatprep.subr.mxu0 %v4936_v2 }
0x1892   :  { %4810 = vmatpush3.msra.mxu0 %v4114_v13 }
0x1893   :  { %4811 = vmatprep.subr.mxu0 %v4936_v2 }
0x1894   :  { %4812 = vmatpush3.msra.mxu0 %v4113_v14 }
0x1895   :  { %4813 = vmatprep.subr.mxu0 %v4936_v2 }
0x1896   :  { %4814 = vmatpush3.msra.mxu0 %v4112_v15 }
0x194f   :  { %v3980_v49 = vpop.f32.mrf.mxu0 }
0x1950   :  { %v3981_v50 = vadd.f32 %v4324_v48, %v3980_v49  ;;  %v4334_v48 = vld [vmem:[%s5716_s3 + $0x1a5] ss:$0 sm:$0xff] }
0x1951   :  { %v4787_v51 = vpop.f32.mrf.mxu0 }
0x1952   :  { %v3984_v52 = vadd.f32 %v3981_v50, %v5379_v27  ;;  %v4020_v27 = vld [vmem:[%s5716_s3 + $0x150] sm:$0xff] }
0x1953   :  { %4793 = vmatpush3.msra.mxu1 %v4020_v27 }
0x1954   :  { %v3987_v53 = vsel %vm199_vm3, %v3984_v52, 0.0  ;;  %4794 = vmatprep.subr.mxu1 %v4936_v2 }
0x1955   :  { %3988 = vadd.xlane.f32.xlu0 %v3987_v53  ;;  %4795 = vmatpush3.msra.mxu1 %v4019_v61 }
0x1956   :  { %4796 = vmatprep.subr.mxu1 %v4936_v2 }
0x1957   :  { %4797 = vmatpush3.msra.mxu1 %v4018_v62 }
0x1958   :  { %4798 = vmatprep.subr.mxu1 %v4936_v2 }
0x1959   :  { %4799 = vmatpush3.msra.mxu1 %v4017_v63 }
0x195a   :  { %4800 = vmatprep.subr.mxu1 %v4936_v2 }
0x195b   :  { %4801 = vmatpush3.msra.mxu1 %v4016_v0 }
0x195c   :  { %4802 = vmatprep.subr.mxu1 %v4936_v2  ;;  %v4331_v2 = vld [vmem:[%s5716_s3 + $0x1a3] ss:$0 sm:$0xff] }
0x195d   :  { %4803 = vmatpush3.msra.mxu1 %v4015_v5 }
0x19de   :  { %v3989_v54 = vpop.xlane.xlu0 %3988 }
0x19df   :  { %v3990_v55 = vmul.f32 0.03125, %v3989_v54 }
0x19e1   :  { %v3991_v56 = vsub.f32 %v3984_v52, %v3990_v55 }
0x19e3   :  { %v3992_v57 = vmul.f32 %v3991_v56, %v3991_v56 }
0x19e5   :  { %v3993_v58 = vsel %vm199_vm3, %v3992_v57, 0.0 }
0x19e6   :  { %3994 = vadd.xlane.f32.xlu1 %v3993_v58 }
0x1a6f   :  { %v3995_v1 = vpop.xlane.xlu1 %3994 }
0x1a70   :  { %v3996_v3 = vmul.f32 0.03125, %v3995_v1 }
0x1a72   :  { %v3997_v4 = vadd.f32 1e-05, %v3996_v3 }
0x1a74   :  { %4906 = vrsqrt.f32 %v3997_v4 }
0x1a81   :  { %v4907_v6 = vpop.eup %4906 }
0x1a82   :  { %v3999_v7 = vmul.f32 %v4907_v6, %v3991_v56 }
0x1a84   :  { %v4004_v9 = vmul.f32 %v4326_v35, %v3999_v7 }
0x1a86   :  { %v4009_v10 = vadd.f32 %v4327_v8, %v4004_v9 }
0x1a88   :  { %4011 = vrot.lane.b32.xlu0 %v4009_v10, %s4938_s19 }
0x1afa   :  { %v4012_v11 = vpop.permute.xlu0 %4011 }
0x1afb   :  { %v4014_v34 = vsel %vm199_vm3, %v5534_v21, %v4012_v11 }
0x1afc   :  { %4805 = vmatmul.mubr.msk.f32.vlgmr.msra.gmra.mxu1 %vm4028_vm5, %v4014_v34 }
0x1bbc   :  { %v4098_v31 = vpop.f32.mrf.mxu1 }
0x1bbd   :  { %v4099_v17 = vadd.f32 %v4328_v16, %v4098_v31 }
0x1bbe   :  { %v4806_v18 = vpop.f32.mrf.mxu1 }
0x1bbf   :  { %v4330_v19 = vmul.f32 -1.442695, %v4099_v17 }
0x1bc1   :  { %4908 = vpow2.f32 %v4330_v19 }
0x1bce   :  { %v4909_v20 = vpop.eup %4908 }
0x1bcf   :  { %v4105_v22 = vadd.f32 1.0, %v4909_v20 }
0x1bd1   :  { %4910 = vrcp.f32 %v4105_v22 }
0x1bde   :  { %v4911_v23 = vpop.eup %4910 }
0x1bdf   :  { %v4109_v24 = vsub.f32 1.0, %v4911_v23  ;;  %v4108_v25 = vmul.f32 %v4911_v23, %v5534_v21 }
0x1be1   :  { %v4110_v26 = vmul.f32 %v4109_v24, %v4009_v10 }
0x1be3   :  { %v4111_v28 = vadd.f32 %v4110_v26, %v4108_v25 }
0x1be5   :  { %4816 = vmatmul.mubr.msk.f32.vlgmr.msra.gmra.mxu0 %vm199_vm3, %v4111_v28 }
0x1ca5   :  { %v4190_v29 = vpop.f32.mrf.mxu0 }
0x1ca6   :  { %v4191_v39 = vadd.f32 %v4331_v2, %v4190_v29 }
0x1ca7   :  { %v4817_v30 = vpop.f32.mrf.mxu0 }
0x1ca8   :  { %v4194_v32 = vadd.f32 %v4191_v39, %v5534_v21  ;;  %v4333_v21 = vld [vmem:[%s5716_s3 + $0x1a4] ss:$0 sm:$0xff] }
0x1caa   :  { %v4195_v33 = vadd.f32 %v4194_v32, %v4009_v10 }
0x1cac   :  { %v4198_v36 = vsel %vm199_vm3, %v4195_v33, 0.0 }
0x1cad   :  { %4199 = vadd.xlane.f32.xlu1 %v4198_v36 }
0x1d36   :  { %v4200_v37 = vpop.xlane.xlu1 %4199 }
0x1d37   :  { %v4201_v38 = vmul.f32 0.03125, %v4200_v37 }
0x1d39   :  { %v4202_v40 = vsub.f32 %v4195_v33, %v4201_v38 }
0x1d3b   :  { %v4203_v41 = vmul.f32 %v4202_v40, %v4202_v40 }
0x1d3d   :  { %v4204_v42 = vsel %vm199_vm3, %v4203_v41, 0.0 }
0x1d3e   :  { %4205 = vadd.xlane.f32.xlu1 %v4204_v42 }
0x1dc7   :  { %v4206_v43 = vpop.xlane.xlu1 %4205 }
0x1dc8   :  { %v4207_v44 = vmul.f32 0.03125, %v4206_v43 }
0x1dca   :  { %v4208_v45 = vadd.f32 1e-05, %v4207_v44 }
0x1dcc   :  { %4912 = vrsqrt.f32 %v4208_v45 }
0x1dd9   :  { %v4913_v46 = vpop.eup %4912 }
0x1dda   :  { %v4210_v47 = vmul.f32 %v4913_v46, %v4202_v40 }
0x1ddc   :  { %v4215_v49 = vmul.f32 %v4333_v21, %v4210_v47 }
0x1dde   :  { %v4220_v50 = vadd.f32 %v4334_v48, %v4215_v49 }
0x1de0   :  { %4221 = vst.msk [vmem:[#allocation2] sm:$0xff] %vm199_vm3, %v4220_v50 }
0x1de1   :  { %4925 = shalt.err (!%p4922_p4)
}
0x1de2   :  { %4231 = dma.vmem_to_hbm [thread:$0]  %s4229_s21, 128, %s5717_s4, [#allocation3]  }
0x1de3   :  { %4934 = dma.done.wait [#allocation3], 128  }
0x1de4   :  { %4935 = vsyncadd [#allocation3], 4294967168 }
0x1de5   :  { %4235 = vsyncpa [#allocation3], 1 }

</bundles_post_ra>
